<compile_context>
chip_gen: v7x
topology: tpu7x:2x2x1
jax: 0.10.0
libtpu: 0.0.40
codegen_flags: <defaults>
</compile_context>

<pallas_src>
import functools

import jax
import jax.numpy as jnp
from jax import lax
from jax.experimental import pallas as pl
from jax.experimental.pallas import tpu as pltpu


# --------------------- deconv (ConvTranspose2d k=2 s=2) ----------------------

def _deconv_kernel(x_ref, w_ref, b_ref, o_ref):
    # x: (1, Cin, H*W); w: (4*Cout, Cin); b: (4*Cout, 1); o: (1, 4*Cout, H*W).
    # Weights as LHS so the long spatial axis stays on lanes; f32 accumulation.
    acc = jnp.dot(w_ref[...], x_ref[0], preferred_element_type=jnp.float32)
    o_ref[0] = (acc + b_ref[...]).astype(o_ref.dtype)


def conv_transpose2x2_s2(x_nchw, w_iohw, b, compute_dtype):
    """PyTorch ConvTranspose2d(k=2, s=2). w_iohw: (Cin, Cout, 2, 2) -> (N, Cout, 2H, 2W)."""
    N, Cin, H, W = x_nchw.shape
    Cout = w_iohw.shape[1]
    HW = H * W
    x2d = x_nchw.reshape(N, Cin, HW).astype(compute_dtype)
    # wmat[(di*2 + dj)*Cout + o, c] = w[c, o, di, dj]
    wmat = jnp.transpose(w_iohw, (2, 3, 1, 0)).reshape(4 * Cout, Cin).astype(compute_dtype)
    bmat = jnp.tile(b, 4).reshape(4 * Cout, 1).astype(jnp.float32)

    sub = pl.pallas_call(
        _deconv_kernel,
        out_shape=jax.ShapeDtypeStruct((N, 4 * Cout, HW), compute_dtype),
        grid=(N,),
        in_specs=[
            pl.BlockSpec((1, Cin, HW), lambda n: (n, 0, 0)),
            pl.BlockSpec((4 * Cout, Cin), lambda n: (0, 0)),
            pl.BlockSpec((4 * Cout, 1), lambda n: (0, 0)),
        ],
        out_specs=pl.BlockSpec((1, 4 * Cout, HW), lambda n: (n, 0, 0)),
        compiler_params=pltpu.CompilerParams(
            dimension_semantics=("parallel",)),
    )(x2d, wmat, bmat)

    # 2x2 pixel-shuffle (stride-2 lane interleave): pure layout glue, XLA pass
    # over the smallest tensor in the block.
    up = sub.reshape(N, 2, 2, Cout, H, W)
    up = jnp.transpose(up, (0, 3, 4, 1, 5, 2)).reshape(N, Cout, 2 * H, 2 * W)
    return up


# ------------------- fused (concat +) conv3x3-ReLU x3 kernel -----------------

def _make_fused_kernel(H2, W2, Cout):
    L = H2 * W2          # flattened raster spatial size -> lane axis
    S = W2 + 1           # slack on each side (covers any +-1 row / +-1 col tap)

    def kernel(up_ref, res_ref, w1u_ref, w1r_ref, b1_ref, w2_ref, b2_ref,
               w3_ref, b3_ref, o_ref, up_buf, res_buf, h_buf):
        dt = up_buf.dtype

        # Stage this image's up / residual maps into the slack-padded flat
        # buffers: two dense VMEM copies, no HBM-side padding needed.
        up_buf[:, pl.ds(S, L)] = up_ref[0]
        res_buf[:, pl.ds(S, L)] = res_ref[0]

        # Zero only the tiny slack regions (2*(W2+1) lanes per buffer).  Doing
        # it every step is ~free and stays correct even if the grid is split
        # across cores (a one-time program_id==0 init would not be).
        for buf in (up_buf, res_buf, h_buf):
            c = buf.shape[0]
            buf[:, pl.ds(0, S)] = jnp.zeros((c, S), dt)
            buf[:, pl.ds(S + L, S)] = jnp.zeros((c, S), dt)

        # Column-edge masks: in the flat layout a +-1 column shift wraps across
        # row boundaries; these zero the wrapped lanes (row out-of-range taps
        # read the zeroed slack instead).
        lane = lax.broadcasted_iota(jnp.int32, (1, L), 1)
        col = lane % W2
        not_left = (col != 0).astype(dt)          # for kx == 0 taps
        not_right = (col != W2 - 1).astype(dt)    # for kx == 2 taps

        def conv3x3_relu(srcs, b_ref):
            # srcs: list of (src_buf, w_ref); w_ref[t] is the (Cout, Cin) tap
            # weight for t = 3*ky + kx.  Nine accumulating MXU matmuls per
            # source; every tap window is a contiguous lane-window slice.
            acc = jnp.zeros((Cout, L), jnp.float32)
            for ky in range(3):
                for kx in range(3):
                    t = 3 * ky + kx
                    off = S + (ky - 1) * W2 + (kx - 1)
                    mask = not_left if kx == 0 else (not_right if kx == 2 else None)
                    for src_buf, w_ref in srcs:
                        win = src_buf[:, pl.ds(off, L)]
                        if mask is not None:
                            win = win * mask
                        acc = acc + jnp.dot(w_ref[t], win,
                                            preferred_element_type=jnp.float32)
            return jnp.maximum(acc + b_ref[...], 0.0)        # (Cout, L) f32

        # conv1 on cat(up, res): accumulate both channel groups, no concat.
        h = conv3x3_relu([(up_buf, w1u_ref), (res_buf, w1r_ref)], b1_ref)

        h_buf[:, pl.ds(S, L)] = h.astype(dt)
        h = conv3x3_relu([(h_buf, w2_ref)], b2_ref)

        h_buf[:, pl.ds(S, L)] = h.astype(dt)
        h = conv3x3_relu([(h_buf, w3_ref)], b3_ref)

        o_ref[0] = h.astype(o_ref.dtype)                     # lane-dense store

    return kernel


# ------------------------------ public wrapper -------------------------------

def deconv_block_forward(x_nchw, res_nchw, p, compute_dtype=jnp.float32):
    """Matches DeconvBlock.forward; NCHW in / NCHW out like PyTorch."""
    N, Cin, H, W = x_nchw.shape
    Cres = res_nchw.shape[1]
    Cout = p["up_w"].shape[1]
    H2, W2 = 2 * H, 2 * W
    L = H2 * W2
    S = W2 + 1
    Ltot = L + 2 * S
    cdt = compute_dtype

    up = conv_transpose2x2_s2(x_nchw, p["up_w"], p["up_b"], cdt)   # (N, Cout, H2, W2)
    up_flat = up.reshape(N, Cout, L)                               # free reshape
    res_flat = res_nchw.reshape(N, Cres, L).astype(cdt)            # free reshape (+cast)

    # Per-tap matmul weights: w[t, o, c] = conv_w[o, c, ky, kx], t = 3*ky + kx.
    # Pre-cast to compute_dtype once here; no per-step casts inside the kernel.
    def tap_weights(w_oihw):
        co, ci = w_oihw.shape[0], w_oihw.shape[1]
        return jnp.transpose(w_oihw, (2, 3, 0, 1)).reshape(9, co, ci).astype(cdt)

    w1 = tap_weights(p["c1_w"])                  # (9, Cout, Cout + Cres)
    w1u = w1[:, :, :Cout]                        # taps on the upsampled channels
    w1r = w1[:, :, Cout:]                        # taps on the residual channels
    w2 = tap_weights(p["c2_w"])
    w3 = tap_weights(p["c3_w"])
    b1 = p["c1_b"].reshape(Cout, 1).astype(jnp.float32)
    b2 = p["c2_b"].reshape(Cout, 1).astype(jnp.float32)
    b3 = p["c3_b"].reshape(Cout, 1).astype(jnp.float32)

    kernel = _make_fused_kernel(H2, W2, Cout)

    out = pl.pallas_call(
        kernel,
        out_shape=jax.ShapeDtypeStruct((N, Cout, L), jnp.float32),
        grid=(N,),
        in_specs=[
            pl.BlockSpec((1, Cout, L), lambda n: (n, 0, 0)),
            pl.BlockSpec((1, Cres, L), lambda n: (n, 0, 0)),
            pl.BlockSpec((9, Cout, Cout), lambda n: (0, 0, 0)),
            pl.BlockSpec((9, Cout, Cres), lambda n: (0, 0, 0)),
            pl.BlockSpec((Cout, 1), lambda n: (0, 0)),
            pl.BlockSpec((9, Cout, Cout), lambda n: (0, 0, 0)),
            pl.BlockSpec((Cout, 1), lambda n: (0, 0)),
            pl.BlockSpec((9, Cout, Cout), lambda n: (0, 0, 0)),
            pl.BlockSpec((Cout, 1), lambda n: (0, 0)),
        ],
        out_specs=pl.BlockSpec((1, Cout, L), lambda n: (n, 0, 0)),
        scratch_shapes=[
            pltpu.VMEM((Cout, Ltot), cdt),   # up,       slack-padded flat
            pltpu.VMEM((Cres, Ltot), cdt),   # residual, slack-padded flat
            pltpu.VMEM((Cout, Ltot), cdt),   # h1 / h2,  slack-padded flat (reused)
        ],
        compiler_params=pltpu.CompilerParams(
            dimension_semantics=("parallel",),
            # 48 MiB: inside 128 MiB on v5e/v6e and leaves headroom on v7x's
            # 64 MiB; actual usage at these shapes is < 1 MiB thanks to the
            # lane-dense layout.
            vmem_limit_bytes=48 * 1024 * 1024,
        ),
    )(up_flat, res_flat, w1u, w1r, b1, w2, b2, w3, b3)

    return out.reshape(N, Cout, H2, W2)          # already NCHW, no transpose


# ----------------------------- pure-JAX reference ----------------------------

def ref_forward(x_nchw, res_nchw, p):
    x = jnp.transpose(x_nchw, (0, 2, 3, 1))
    res = jnp.transpose(res_nchw, (0, 2, 3, 1))
    # ConvTranspose2d: out[n, 2i+di, 2j+dj, o] += x[n,i,j,c] * W[c,o,di,dj]
    t = jnp.einsum("nijc,codw->nidjwo", x, p["up_w"])
    N, H, _, W, _, Co = t.shape
    up = t.reshape(N, 2 * H, 2 * W, Co) + p["up_b"]
    h = jnp.concatenate([up, res], axis=-1)
    for wk, bk in (("c1_w", "c1_b"), ("c2_w", "c2_b"), ("c3_w", "c3_b")):
        w = jnp.transpose(p[wk], (2, 3, 1, 0))  # OIHW -> HWIO
        h = lax.conv_general_dilated(
            h, w, (1, 1), "SAME",
            dimension_numbers=("NHWC", "HWIO", "NHWC")) + p[bk]
        h = jnp.maximum(h, 0.0)
    return jnp.transpose(h, (0, 3, 1, 2))


# ----------------------------------- main ------------------------------------

if __name__ == "__main__":
    in_ch, out_ch = 8, 4
    N, H, W = 2, 8, 8

    key = jax.random.PRNGKey(0)
    keys = jax.random.split(key, 10)
    x = jax.random.normal(keys[0], (N, in_ch, H, W), jnp.float32)
    residual = jax.random.normal(keys[1], (N, in_ch, 2 * H, 2 * W), jnp.float32)

    params = {
        "up_w": 0.1 * jax.random.normal(keys[2], (in_ch, out_ch, 2, 2), jnp.float32),
        "up_b": 0.1 * jax.random.normal(keys[3], (out_ch,), jnp.float32),
        "c1_w": 0.1 * jax.random.normal(keys[4], (out_ch, in_ch + out_ch, 3, 3), jnp.float32),
        "c1_b": 0.1 * jax.random.normal(keys[5], (out_ch,), jnp.float32),
        "c2_w": 0.1 * jax.random.normal(keys[6], (out_ch, out_ch, 3, 3), jnp.float32),
        "c2_b": 0.1 * jax.random.normal(keys[7], (out_ch,), jnp.float32),
        "c3_w": 0.1 * jax.random.normal(keys[8], (out_ch, out_ch, 3, 3), jnp.float32),
        "c3_b": 0.1 * jax.random.normal(keys[9], (out_ch,), jnp.float32),
    }

    ref = ref_forward(x, residual, params)

    # f32 operands: exact semantics of the PyTorch module.
    fwd_f32 = jax.jit(functools.partial(deconv_block_forward, compute_dtype=jnp.float32))
    out = jax.block_until_ready(fwd_f32(x, residual, params))
    assert out.shape == (N, out_ch, 2 * H, 2 * W), out.shape
    max_err = float(jnp.max(jnp.abs(out - ref)))
    assert jnp.allclose(out, ref, atol=1e-4, rtol=1e-4), max_err

    # bf16 MXU operands + bf16 scratch, f32 accumulation: fast path on
    # v5e / v6e / v7x alike (the MXU takes bf16 at full rate on all three).
    fwd_bf16 = jax.jit(functools.partial(deconv_block_forward, compute_dtype=jnp.bfloat16))
    out_bf = jax.block_until_ready(fwd_bf16(x, residual, params))
    max_err_bf = float(jnp.max(jnp.abs(out_bf - ref)))
    assert jnp.allclose(out_bf, ref, atol=1e-1, rtol=1e-1), max_err_bf

    print("KERNEL_OK")
</pallas_src>

<mosaic_0001>
module attributes {stable_mosaic.version = 11 : i64} {
  func.func @_deconv_kernel(%arg0: i32, %arg1: memref<1x8x64xf32, #tpu.memory_space<vmem>>, %arg2: memref<16x8xf32, #tpu.memory_space<vmem>>, %arg3: memref<16x1xf32, #tpu.memory_space<vmem>>, %arg4: memref<1x16x64xf32, #tpu.memory_space<vmem>>) attributes {dimension_semantics = [#tpu.dimension_semantics<parallel>], iteration_bounds = array<i64: 2>, scalar_prefetch = 0 : i64, scratch_operands = 0 : i64, tpu.core_type = #tpu.core_type<tc>, window_params = [{transform_indices = @transform_0, window_bounds = array<i64: 1, 8, 64>}, {pipeline_mode = #tpu.pipeline_mode<synchronous>, transform_indices = @transform_1, window_bounds = array<i64: 16, 8>}, {pipeline_mode = #tpu.pipeline_mode<synchronous>, transform_indices = @transform_2, window_bounds = array<i64: 16, 1>}, {transform_indices = @transform_3, window_bounds = array<i64: 1, 16, 64>}]} {
    %c0 = arith.constant 0 : index
    %c0_0 = arith.constant 0 : index
    %0 = vector.load %arg2[%c0, %c0_0] : memref<16x8xf32, #tpu.memory_space<vmem>>, vector<16x8xf32>
    %c0_1 = arith.constant 0 : index
    %c0_2 = arith.constant 0 : index
    %c0_3 = arith.constant 0 : index
    %1 = vector.load %arg1[%c0_1, %c0_2, %c0_3] : memref<1x8x64xf32, #tpu.memory_space<vmem>>, vector<1x8x64xf32>
    %2 = vector.shape_cast %1 : vector<1x8x64xf32> to vector<8x64xf32>
    %cst = arith.constant dense<0.000000e+00> : vector<16x64xf32>
    %3 = tpu.matmul %0, %2, %cst {dimension_numbers = #tpu.dot_dimension_numbers<[1], [0], [0], [1], [0, 0, 1, 1], [], []>} : vector<16x8xf32>, vector<8x64xf32>, vector<16x64xf32> -> vector<16x64xf32>
    %c0_4 = arith.constant 0 : index
    %c0_5 = arith.constant 0 : index
    %4 = vector.load %arg3[%c0_4, %c0_5] : memref<16x1xf32, #tpu.memory_space<vmem>>, vector<16x1xf32>
    %5 = vector.broadcast %4 : vector<16x1xf32> to vector<16x64xf32>
    %6 = arith.addf %3, %5 : vector<16x64xf32>
    %c0_6 = arith.constant 0 : index
    %c0_7 = arith.constant 0 : index
    %c0_8 = arith.constant 0 : index
    %7 = vector.load %arg4[%c0_6, %c0_7, %c0_8] : memref<1x16x64xf32, #tpu.memory_space<vmem>>, vector<1x16x64xf32>
    %8 = vector.shape_cast %7 : vector<1x16x64xf32> to vector<16x64xf32>
    %9 = vector.shape_cast %6 : vector<16x64xf32> to vector<1x16x64xf32>
    tpu.vector_store %arg4[%c0_6, %c0_7, %c0_8], %9 {strides = array<i32>} : memref<1x16x64xf32, #tpu.memory_space<vmem>>, vector<1x16x64xf32>,
    return
  }
  func.func @transform_0(%arg0: i32) -> (i32, i32, i32) {
    %c0_i32 = arith.constant 0 : i32
    %c0_i32_0 = arith.constant 0 : i32
    %c0_i32_1 = arith.constant 0 : i32
    return %arg0, %c0_i32, %c0_i32_0 : i32, i32, i32
  }
  func.func @transform_1(%arg0: i32) -> (i32, i32) {
    %c0_i32 = arith.constant 0 : i32
    %c0_i32_0 = arith.constant 0 : i32
    %c0_i32_1 = arith.constant 0 : i32
    return %c0_i32, %c0_i32_0 : i32, i32
  }
  func.func @transform_2(%arg0: i32) -> (i32, i32) {
    %c0_i32 = arith.constant 0 : i32
    %c0_i32_0 = arith.constant 0 : i32
    %c0_i32_1 = arith.constant 0 : i32
    return %c0_i32, %c0_i32_0 : i32, i32
  }
  func.func @transform_3(%arg0: i32) -> (i32, i32, i32) {
    %c0_i32 = arith.constant 0 : i32
    %c0_i32_0 = arith.constant 0 : i32
    %c0_i32_1 = arith.constant 0 : i32
    return %arg0, %c0_i32, %c0_i32_0 : i32, i32, i32
  }
}

module attributes {stable_mosaic.version = 11 : i64} {
  func.func @kernel(%arg0: i32, %arg1: memref<1x4x256xf32, #tpu.memory_space<vmem>>, %arg2: memref<1x8x256xf32, #tpu.memory_space<vmem>>, %arg3: memref<9x4x4xf32, #tpu.memory_space<vmem>>, %arg4: memref<9x4x8xf32, #tpu.memory_space<vmem>>, %arg5: memref<4x1xf32, #tpu.memory_space<vmem>>, %arg6: memref<9x4x4xf32, #tpu.memory_space<vmem>>, %arg7: memref<4x1xf32, #tpu.memory_space<vmem>>, %arg8: memref<9x4x4xf32, #tpu.memory_space<vmem>>, %arg9: memref<4x1xf32, #tpu.memory_space<vmem>>, %arg10: memref<1x4x256xf32, #tpu.memory_space<vmem>>, %arg11: memref<4x290xf32, #tpu.memory_space<vmem>>, %arg12: memref<8x290xf32, #tpu.memory_space<vmem>>, %arg13: memref<4x290xf32, #tpu.memory_space<vmem>>) attributes {dimension_semantics = [#tpu.dimension_semantics<parallel>], iteration_bounds = array<i64: 2>, scalar_prefetch = 0 : i64, scratch_operands = 3 : i64, tpu.core_type = #tpu.core_type<tc>, window_params = [{transform_indices = @transform_0, window_bounds = array<i64: 1, 4, 256>}, {transform_indices = @transform_1, window_bounds = array<i64: 1, 8, 256>}, {pipeline_mode = #tpu.pipeline_mode<synchronous>, transform_indices = @transform_2, window_bounds = array<i64: 9, 4, 4>}, {pipeline_mode = #tpu.pipeline_mode<synchronous>, transform_indices = @transform_3, window_bounds = array<i64: 9, 4, 8>}, {pipeline_mode = #tpu.pipeline_mode<synchronous>, transform_indices = @transform_4, window_bounds = array<i64: 4, 1>}, {pipeline_mode = #tpu.pipeline_mode<synchronous>, transform_indices = @transform_5, window_bounds = array<i64: 9, 4, 4>}, {pipeline_mode = #tpu.pipeline_mode<synchronous>, transform_indices = @transform_6, window_bounds = array<i64: 4, 1>}, {pipeline_mode = #tpu.pipeline_mode<synchronous>, transform_indices = @transform_7, window_bounds = array<i64: 9, 4, 4>}, {pipeline_mode = #tpu.pipeline_mode<synchronous>, transform_indices = @transform_8, window_bounds = array<i64: 4, 1>}, {transform_indices = @transform_9, window_bounds = array<i64: 1, 4, 256>}]} {
    %c0 = arith.constant 0 : index
    %c0_0 = arith.constant 0 : index
    %c0_1 = arith.constant 0 : index
    %0 = vector.load %arg1[%c0, %c0_0, %c0_1] : memref<1x4x256xf32, #tpu.memory_space<vmem>>, vector<1x4x256xf32>
    %1 = vector.shape_cast %0 : vector<1x4x256xf32> to vector<4x256xf32>
    %c0_2 = arith.constant 0 : index
    %c17 = arith.constant 17 : index
    %2 = vector.load %arg11[%c0_2, %c17] : memref<4x290xf32, #tpu.memory_space<vmem>>, vector<4x256xf32>
    tpu.vector_store %arg11[%c0_2, %c17], %1 {strides = array<i32>} : memref<4x290xf32, #tpu.memory_space<vmem>>, vector<4x256xf32>,
    %c0_3 = arith.constant 0 : index
    %c0_4 = arith.constant 0 : index
    %c0_5 = arith.constant 0 : index
    %3 = vector.load %arg2[%c0_3, %c0_4, %c0_5] : memref<1x8x256xf32, #tpu.memory_space<vmem>>, vector<1x8x256xf32>
    %4 = vector.shape_cast %3 : vector<1x8x256xf32> to vector<8x256xf32>
    %c0_6 = arith.constant 0 : index
    %c17_7 = arith.constant 17 : index
    %5 = vector.load %arg12[%c0_6, %c17_7] : memref<8x290xf32, #tpu.memory_space<vmem>>, vector<8x256xf32>
    tpu.vector_store %arg12[%c0_6, %c17_7], %4 {strides = array<i32>} : memref<8x290xf32, #tpu.memory_space<vmem>>, vector<8x256xf32>,
    %cst = arith.constant 0.000000e+00 : f32
    %6 = vector.broadcast %cst : f32 to vector<4x17xf32>
    %c0_8 = arith.constant 0 : index
    %c0_9 = arith.constant 0 : index
    %7 = vector.load %arg11[%c0_8, %c0_9] : memref<4x290xf32, #tpu.memory_space<vmem>>, vector<4x17xf32>
    tpu.vector_store %arg11[%c0_8, %c0_9], %6 {strides = array<i32>} : memref<4x290xf32, #tpu.memory_space<vmem>>, vector<4x17xf32>,
    %cst_10 = arith.constant 0.000000e+00 : f32
    %8 = vector.broadcast %cst_10 : f32 to vector<4x17xf32>
    %c0_11 = arith.constant 0 : index
    %c273 = arith.constant 273 : index
    %9 = vector.load %arg11[%c0_11, %c273] : memref<4x290xf32, #tpu.memory_space<vmem>>, vector<4x17xf32>
    tpu.vector_store %arg11[%c0_11, %c273], %8 {strides = array<i32>} : memref<4x290xf32, #tpu.memory_space<vmem>>, vector<4x17xf32>,
    %cst_12 = arith.constant 0.000000e+00 : f32
    %10 = vector.broadcast %cst_12 : f32 to vector<8x17xf32>
    %c0_13 = arith.constant 0 : index
    %c0_14 = arith.constant 0 : index
    %11 = vector.load %arg12[%c0_13, %c0_14] : memref<8x290xf32, #tpu.memory_space<vmem>>, vector<8x17xf32>
    tpu.vector_store %arg12[%c0_13, %c0_14], %10 {strides = array<i32>} : memref<8x290xf32, #tpu.memory_space<vmem>>, vector<8x17xf32>,
    %cst_15 = arith.constant 0.000000e+00 : f32
    %12 = vector.broadcast %cst_15 : f32 to vector<8x17xf32>
    %c0_16 = arith.constant 0 : index
    %c273_17 = arith.constant 273 : index
    %13 = vector.load %arg12[%c0_16, %c273_17] : memref<8x290xf32, #tpu.memory_space<vmem>>, vector<8x17xf32>
    tpu.vector_store %arg12[%c0_16, %c273_17], %12 {strides = array<i32>} : memref<8x290xf32, #tpu.memory_space<vmem>>, vector<8x17xf32>,
    %cst_18 = arith.constant 0.000000e+00 : f32
    %14 = vector.broadcast %cst_18 : f32 to vector<4x17xf32>
    %c0_19 = arith.constant 0 : index
    %c0_20 = arith.constant 0 : index
    %15 = vector.load %arg13[%c0_19, %c0_20] : memref<4x290xf32, #tpu.memory_space<vmem>>, vector<4x17xf32>
    tpu.vector_store %arg13[%c0_19, %c0_20], %14 {strides = array<i32>} : memref<4x290xf32, #tpu.memory_space<vmem>>, vector<4x17xf32>,
    %cst_21 = arith.constant 0.000000e+00 : f32
    %16 = vector.broadcast %cst_21 : f32 to vector<4x17xf32>
    %c0_22 = arith.constant 0 : index
    %c273_23 = arith.constant 273 : index
    %17 = vector.load %arg13[%c0_22, %c273_23] : memref<4x290xf32, #tpu.memory_space<vmem>>, vector<4x17xf32>
    tpu.vector_store %arg13[%c0_22, %c273_23], %16 {strides = array<i32>} : memref<4x290xf32, #tpu.memory_space<vmem>>, vector<4x17xf32>,
    %18 = tpu.iota {dimensions = array<i32: 1>} : vector<1x256xi32>
    %c16_i32 = arith.constant 16 : i32
    %c0_i32 = arith.constant 0 : i32
    %19 = arith.cmpi eq, %c16_i32, %c0_i32 : i32
    %c1_i32 = arith.constant 1 : i32
    %20 = arith.select %19, %c1_i32, %c16_i32 : i32
    %21 = vector.broadcast %20 : i32 to vector<1x256xi32>
    %22 = arith.remsi %18, %21 : vector<1x256xi32>
    %c0_i32_24 = arith.constant 0 : i32
    %23 = vector.broadcast %c0_i32_24 : i32 to vector<1x256xi32>
    %24 = arith.cmpi ne, %22, %23 : vector<1x256xi32>
    %c0_i32_25 = arith.constant 0 : i32
    %25 = vector.broadcast %c0_i32_25 : i32 to vector<1x256xi32>
    %26 = arith.cmpi slt, %22, %25 : vector<1x256xi32>
    %c0_i32_26 = arith.constant 0 : i32
    %27 = arith.cmpi slt, %20, %c0_i32_26 : i32
    %28 = vector.broadcast %27 : i1 to vector<1x256xi1>
    %29 = vector.broadcast %28 : vector<1x256xi1> to vector<1x256xi1>
    %30 = arith.xori %26, %29 : vector<1x256xi1>
    %31 = arith.andi %30, %24 : vector<1x256xi1>
    %32 = vector.broadcast %20 : i32 to vector<1x256xi32>
    %33 = arith.addi %22, %32 : vector<1x256xi32>
    %34 = arith.select %31, %33, %22 : vector<1x256xi1>, vector<1x256xi32>
    %c0_i32_27 = arith.constant 0 : i32
    %35 = vector.broadcast %c0_i32_27 : i32 to vector<1x256xi32>
    %36 = arith.cmpi ne, %34, %35 : vector<1x256xi32>
    %37 = arith.extui %36 : vector<1x256xi1> to vector<1x256xi32>
    %38 = arith.sitofp %37 : vector<1x256xi32> to vector<1x256xf32>
    %c15_i32 = arith.constant 15 : i32
    %39 = vector.broadcast %c15_i32 : i32 to vector<1x256xi32>
    %40 = arith.cmpi ne, %34, %39 : vector<1x256xi32>
    %41 = arith.extui %40 : vector<1x256xi1> to vector<1x256xi32>
    %42 = arith.sitofp %41 : vector<1x256xi32> to vector<1x256xf32>
    %cst_28 = arith.constant 0.000000e+00 : f32
    %43 = vector.broadcast %cst_28 : f32 to vector<4x256xf32>
    %c0_29 = arith.constant 0 : index
    %c0_30 = arith.constant 0 : index
    %44 = vector.load %arg11[%c0_29, %c0_30] : memref<4x290xf32, #tpu.memory_space<vmem>>, vector<4x256xf32>
    %45 = vector.broadcast %38 : vector<1x256xf32> to vector<4x256xf32>
    %46 = arith.mulf %44, %45 : vector<4x256xf32>
    %c0_31 = arith.constant 0 : index
    %c0_32 = arith.constant 0 : index
    %c0_33 = arith.constant 0 : index
    %47 = vector.load %arg3[%c0_31, %c0_32, %c0_33] : memref<9x4x4xf32, #tpu.memory_space<vmem>>, vector<1x4x4xf32>
    %48 = vector.shape_cast %47 : vector<1x4x4xf32> to vector<4x4xf32>
    %cst_34 = arith.constant dense<0.000000e+00> : vector<4x256xf32>
    %49 = tpu.matmul %48, %46, %cst_34 {dimension_numbers = #tpu.dot_dimension_numbers<[1], [0], [0], [1], [0, 0, 1, 1], [], []>} : vector<4x4xf32>, vector<4x256xf32>, vector<4x256xf32> -> vector<4x256xf32>
    %50 = arith.addf %43, %49 : vector<4x256xf32>
    %c0_35 = arith.constant 0 : index
    %c0_36 = arith.constant 0 : index
    %51 = vector.load %arg12[%c0_35, %c0_36] : memref<8x290xf32, #tpu.memory_space<vmem>>, vector<8x256xf32>
    %52 = vector.broadcast %38 : vector<1x256xf32> to vector<8x256xf32>
    %53 = arith.mulf %51, %52 : vector<8x256xf32>
    %c0_37 = arith.constant 0 : index
    %c0_38 = arith.constant 0 : index
    %c0_39 = arith.constant 0 : index
    %54 = vector.load %arg4[%c0_37, %c0_38, %c0_39] : memref<9x4x8xf32, #tpu.memory_space<vmem>>, vector<1x4x8xf32>
    %55 = vector.shape_cast %54 : vector<1x4x8xf32> to vector<4x8xf32>
    %cst_40 = arith.constant dense<0.000000e+00> : vector<4x256xf32>
    %56 = tpu.matmul %55, %53, %cst_40 {dimension_numbers = #tpu.dot_dimension_numbers<[1], [0], [0], [1], [0, 0, 1, 1], [], []>} : vector<4x8xf32>, vector<8x256xf32>, vector<4x256xf32> -> vector<4x256xf32>
    %57 = arith.addf %50, %56 : vector<4x256xf32>
    %c0_41 = arith.constant 0 : index
    %c1 = arith.constant 1 : index
    %58 = vector.load %arg11[%c0_41, %c1] : memref<4x290xf32, #tpu.memory_space<vmem>>, vector<4x256xf32>
    %c1_42 = arith.constant 1 : index
    %c0_43 = arith.constant 0 : index
    %c0_44 = arith.constant 0 : index
    %59 = vector.load %arg3[%c1_42, %c0_43, %c0_44] : memref<9x4x4xf32, #tpu.memory_space<vmem>>, vector<1x4x4xf32>
    %60 = vector.shape_cast %59 : vector<1x4x4xf32> to vector<4x4xf32>
    %cst_45 = arith.constant dense<0.000000e+00> : vector<4x256xf32>
    %61 = tpu.matmul %60, %58, %cst_45 {dimension_numbers = #tpu.dot_dimension_numbers<[1], [0], [0], [1], [0, 0, 1, 1], [], []>} : vector<4x4xf32>, vector<4x256xf32>, vector<4x256xf32> -> vector<4x256xf32>
    %62 = arith.addf %57, %61 : vector<4x256xf32>
    %c0_46 = arith.constant 0 : index
    %c1_47 = arith.constant 1 : index
    %63 = vector.load %arg12[%c0_46, %c1_47] : memref<8x290xf32, #tpu.memory_space<vmem>>, vector<8x256xf32>
    %c1_48 = arith.constant 1 : index
    %c0_49 = arith.constant 0 : index
    %c0_50 = arith.constant 0 : index
    %64 = vector.load %arg4[%c1_48, %c0_49, %c0_50] : memref<9x4x8xf32, #tpu.memory_space<vmem>>, vector<1x4x8xf32>
    %65 = vector.shape_cast %64 : vector<1x4x8xf32> to vector<4x8xf32>
    %cst_51 = arith.constant dense<0.000000e+00> : vector<4x256xf32>
    %66 = tpu.matmul %65, %63, %cst_51 {dimension_numbers = #tpu.dot_dimension_numbers<[1], [0], [0], [1], [0, 0, 1, 1], [], []>} : vector<4x8xf32>, vector<8x256xf32>, vector<4x256xf32> -> vector<4x256xf32>
    %67 = arith.addf %62, %66 : vector<4x256xf32>
    %c0_52 = arith.constant 0 : index
    %c2 = arith.constant 2 : index
    %68 = vector.load %arg11[%c0_52, %c2] : memref<4x290xf32, #tpu.memory_space<vmem>>, vector<4x256xf32>
    %69 = vector.broadcast %42 : vector<1x256xf32> to vector<4x256xf32>
    %70 = arith.mulf %68, %69 : vector<4x256xf32>
    %c2_53 = arith.constant 2 : index
    %c0_54 = arith.constant 0 : index
    %c0_55 = arith.constant 0 : index
    %71 = vector.load %arg3[%c2_53, %c0_54, %c0_55] : memref<9x4x4xf32, #tpu.memory_space<vmem>>, vector<1x4x4xf32>
    %72 = vector.shape_cast %71 : vector<1x4x4xf32> to vector<4x4xf32>
    %cst_56 = arith.constant dense<0.000000e+00> : vector<4x256xf32>
    %73 = tpu.matmul %72, %70, %cst_56 {dimension_numbers = #tpu.dot_dimension_numbers<[1], [0], [0], [1], [0, 0, 1, 1], [], []>} : vector<4x4xf32>, vector<4x256xf32>, vector<4x256xf32> -> vector<4x256xf32>
    %74 = arith.addf %67, %73 : vector<4x256xf32>
    %c0_57 = arith.constant 0 : index
    %c2_58 = arith.constant 2 : index
    %75 = vector.load %arg12[%c0_57, %c2_58] : memref<8x290xf32, #tpu.memory_space<vmem>>, vector<8x256xf32>
    %76 = vector.broadcast %42 : vector<1x256xf32> to vector<8x256xf32>
    %77 = arith.mulf %75, %76 : vector<8x256xf32>
    %c2_59 = arith.constant 2 : index
    %c0_60 = arith.constant 0 : index
    %c0_61 = arith.constant 0 : index
    %78 = vector.load %arg4[%c2_59, %c0_60, %c0_61] : memref<9x4x8xf32, #tpu.memory_space<vmem>>, vector<1x4x8xf32>
    %79 = vector.shape_cast %78 : vector<1x4x8xf32> to vector<4x8xf32>
    %cst_62 = arith.constant dense<0.000000e+00> : vector<4x256xf32>
    %80 = tpu.matmul %79, %77, %cst_62 {dimension_numbers = #tpu.dot_dimension_numbers<[1], [0], [0], [1], [0, 0, 1, 1], [], []>} : vector<4x8xf32>, vector<8x256xf32>, vector<4x256xf32> -> vector<4x256xf32>
    %81 = arith.addf %74, %80 : vector<4x256xf32>
    %c0_63 = arith.constant 0 : index
    %c16 = arith.constant 16 : index
    %82 = vector.load %arg11[%c0_63, %c16] : memref<4x290xf32, #tpu.memory_space<vmem>>, vector<4x256xf32>
    %83 = vector.broadcast %38 : vector<1x256xf32> to vector<4x256xf32>
    %84 = arith.mulf %82, %83 : vector<4x256xf32>
    %c3 = arith.constant 3 : index
    %c0_64 = arith.constant 0 : index
    %c0_65 = arith.constant 0 : index
    %85 = vector.load %arg3[%c3, %c0_64, %c0_65] : memref<9x4x4xf32, #tpu.memory_space<vmem>>, vector<1x4x4xf32>
    %86 = vector.shape_cast %85 : vector<1x4x4xf32> to vector<4x4xf32>
    %cst_66 = arith.constant dense<0.000000e+00> : vector<4x256xf32>
    %87 = tpu.matmul %86, %84, %cst_66 {dimension_numbers = #tpu.dot_dimension_numbers<[1], [0], [0], [1], [0, 0, 1, 1], [], []>} : vector<4x4xf32>, vector<4x256xf32>, vector<4x256xf32> -> vector<4x256xf32>
    %88 = arith.addf %81, %87 : vector<4x256xf32>
    %c0_67 = arith.constant 0 : index
    %c16_68 = arith.constant 16 : index
    %89 = vector.load %arg12[%c0_67, %c16_68] : memref<8x290xf32, #tpu.memory_space<vmem>>, vector<8x256xf32>
    %90 = vector.broadcast %38 : vector<1x256xf32> to vector<8x256xf32>
    %91 = arith.mulf %89, %90 : vector<8x256xf32>
    %c3_69 = arith.constant 3 : index
    %c0_70 = arith.constant 0 : index
    %c0_71 = arith.constant 0 : index
    %92 = vector.load %arg4[%c3_69, %c0_70, %c0_71] : memref<9x4x8xf32, #tpu.memory_space<vmem>>, vector<1x4x8xf32>
    %93 = vector.shape_cast %92 : vector<1x4x8xf32> to vector<4x8xf32>
    %cst_72 = arith.constant dense<0.000000e+00> : vector<4x256xf32>
    %94 = tpu.matmul %93, %91, %cst_72 {dimension_numbers = #tpu.dot_dimension_numbers<[1], [0], [0], [1], [0, 0, 1, 1], [], []>} : vector<4x8xf32>, vector<8x256xf32>, vector<4x256xf32> -> vector<4x256xf32>
    %95 = arith.addf %88, %94 : vector<4x256xf32>
    %c0_73 = arith.constant 0 : index
    %c17_74 = arith.constant 17 : index
    %96 = vector.load %arg11[%c0_73, %c17_74] : memref<4x290xf32, #tpu.memory_space<vmem>>, vector<4x256xf32>
    %c4 = arith.constant 4 : index
    %c0_75 = arith.constant 0 : index
    %c0_76 = arith.constant 0 : index
    %97 = vector.load %arg3[%c4, %c0_75, %c0_76] : memref<9x4x4xf32, #tpu.memory_space<vmem>>, vector<1x4x4xf32>
    %98 = vector.shape_cast %97 : vector<1x4x4xf32> to vector<4x4xf32>
    %cst_77 = arith.constant dense<0.000000e+00> : vector<4x256xf32>
    %99 = tpu.matmul %98, %96, %cst_77 {dimension_numbers = #tpu.dot_dimension_numbers<[1], [0], [0], [1], [0, 0, 1, 1], [], []>} : vector<4x4xf32>, vector<4x256xf32>, vector<4x256xf32> -> vector<4x256xf32>
    %100 = arith.addf %95, %99 : vector<4x256xf32>
    %c0_78 = arith.constant 0 : index
    %c17_79 = arith.constant 17 : index
    %101 = vector.load %arg12[%c0_78, %c17_79] : memref<8x290xf32, #tpu.memory_space<vmem>>, vector<8x256xf32>
    %c4_80 = arith.constant 4 : index
    %c0_81 = arith.constant 0 : index
    %c0_82 = arith.constant 0 : index
    %102 = vector.load %arg4[%c4_80, %c0_81, %c0_82] : memref<9x4x8xf32, #tpu.memory_space<vmem>>, vector<1x4x8xf32>
    %103 = vector.shape_cast %102 : vector<1x4x8xf32> to vector<4x8xf32>
    %cst_83 = arith.constant dense<0.000000e+00> : vector<4x256xf32>
    %104 = tpu.matmul %103, %101, %cst_83 {dimension_numbers = #tpu.dot_dimension_numbers<[1], [0], [0], [1], [0, 0, 1, 1], [], []>} : vector<4x8xf32>, vector<8x256xf32>, vector<4x256xf32> -> vector<4x256xf32>
    %105 = arith.addf %100, %104 : vector<4x256xf32>
    %c0_84 = arith.constant 0 : index
    %c18 = arith.constant 18 : index
    %106 = vector.load %arg11[%c0_84, %c18] : memref<4x290xf32, #tpu.memory_space<vmem>>, vector<4x256xf32>
    %107 = vector.broadcast %42 : vector<1x256xf32> to vector<4x256xf32>
    %108 = arith.mulf %106, %107 : vector<4x256xf32>
    %c5 = arith.constant 5 : index
    %c0_85 = arith.constant 0 : index
    %c0_86 = arith.constant 0 : index
    %109 = vector.load %arg3[%c5, %c0_85, %c0_86] : memref<9x4x4xf32, #tpu.memory_space<vmem>>, vector<1x4x4xf32>
    %110 = vector.shape_cast %109 : vector<1x4x4xf32> to vector<4x4xf32>
    %cst_87 = arith.constant dense<0.000000e+00> : vector<4x256xf32>
    %111 = tpu.matmul %110, %108, %cst_87 {dimension_numbers = #tpu.dot_dimension_numbers<[1], [0], [0], [1], [0, 0, 1, 1], [], []>} : vector<4x4xf32>, vector<4x256xf32>, vector<4x256xf32> -> vector<4x256xf32>
    %112 = arith.addf %105, %111 : vector<4x256xf32>
    %c0_88 = arith.constant 0 : index
    %c18_89 = arith.constant 18 : index
    %113 = vector.load %arg12[%c0_88, %c18_89] : memref<8x290xf32, #tpu.memory_space<vmem>>, vector<8x256xf32>
    %114 = vector.broadcast %42 : vector<1x256xf32> to vector<8x256xf32>
    %115 = arith.mulf %113, %114 : vector<8x256xf32>
    %c5_90 = arith.constant 5 : index
    %c0_91 = arith.constant 0 : index
    %c0_92 = arith.constant 0 : index
    %116 = vector.load %arg4[%c5_90, %c0_91, %c0_92] : memref<9x4x8xf32, #tpu.memory_space<vmem>>, vector<1x4x8xf32>
    %117 = vector.shape_cast %116 : vector<1x4x8xf32> to vector<4x8xf32>
    %cst_93 = arith.constant dense<0.000000e+00> : vector<4x256xf32>
    %118 = tpu.matmul %117, %115, %cst_93 {dimension_numbers = #tpu.dot_dimension_numbers<[1], [0], [0], [1], [0, 0, 1, 1], [], []>} : vector<4x8xf32>, vector<8x256xf32>, vector<4x256xf32> -> vector<4x256xf32>
    %119 = arith.addf %112, %118 : vector<4x256xf32>
    %c0_94 = arith.constant 0 : index
    %c32 = arith.constant 32 : index
    %120 = vector.load %arg11[%c0_94, %c32] : memref<4x290xf32, #tpu.memory_space<vmem>>, vector<4x256xf32>
    %121 = vector.broadcast %38 : vector<1x256xf32> to vector<4x256xf32>
    %122 = arith.mulf %120, %121 : vector<4x256xf32>
    %c6 = arith.constant 6 : index
    %c0_95 = arith.constant 0 : index
    %c0_96 = arith.constant 0 : index
    %123 = vector.load %arg3[%c6, %c0_95, %c0_96] : memref<9x4x4xf32, #tpu.memory_space<vmem>>, vector<1x4x4xf32>
    %124 = vector.shape_cast %123 : vector<1x4x4xf32> to vector<4x4xf32>
    %cst_97 = arith.constant dense<0.000000e+00> : vector<4x256xf32>
    %125 = tpu.matmul %124, %122, %cst_97 {dimension_numbers = #tpu.dot_dimension_numbers<[1], [0], [0], [1], [0, 0, 1, 1], [], []>} : vector<4x4xf32>, vector<4x256xf32>, vector<4x256xf32> -> vector<4x256xf32>
    %126 = arith.addf %119, %125 : vector<4x256xf32>
    %c0_98 = arith.constant 0 : index
    %c32_99 = arith.constant 32 : index
    %127 = vector.load %arg12[%c0_98, %c32_99] : memref<8x290xf32, #tpu.memory_space<vmem>>, vector<8x256xf32>
    %128 = vector.broadcast %38 : vector<1x256xf32> to vector<8x256xf32>
    %129 = arith.mulf %127, %128 : vector<8x256xf32>
    %c6_100 = arith.constant 6 : index
    %c0_101 = arith.constant 0 : index
    %c0_102 = arith.constant 0 : index
    %130 = vector.load %arg4[%c6_100, %c0_101, %c0_102] : memref<9x4x8xf32, #tpu.memory_space<vmem>>, vector<1x4x8xf32>
    %131 = vector.shape_cast %130 : vector<1x4x8xf32> to vector<4x8xf32>
    %cst_103 = arith.constant dense<0.000000e+00> : vector<4x256xf32>
    %132 = tpu.matmul %131, %129, %cst_103 {dimension_numbers = #tpu.dot_dimension_numbers<[1], [0], [0], [1], [0, 0, 1, 1], [], []>} : vector<4x8xf32>, vector<8x256xf32>, vector<4x256xf32> -> vector<4x256xf32>
    %133 = arith.addf %126, %132 : vector<4x256xf32>
    %c0_104 = arith.constant 0 : index
    %c33 = arith.constant 33 : index
    %134 = vector.load %arg11[%c0_104, %c33] : memref<4x290xf32, #tpu.memory_space<vmem>>, vector<4x256xf32>
    %c7 = arith.constant 7 : index
    %c0_105 = arith.constant 0 : index
    %c0_106 = arith.constant 0 : index
    %135 = vector.load %arg3[%c7, %c0_105, %c0_106] : memref<9x4x4xf32, #tpu.memory_space<vmem>>, vector<1x4x4xf32>
    %136 = vector.shape_cast %135 : vector<1x4x4xf32> to vector<4x4xf32>
    %cst_107 = arith.constant dense<0.000000e+00> : vector<4x256xf32>
    %137 = tpu.matmul %136, %134, %cst_107 {dimension_numbers = #tpu.dot_dimension_numbers<[1], [0], [0], [1], [0, 0, 1, 1], [], []>} : vector<4x4xf32>, vector<4x256xf32>, vector<4x256xf32> -> vector<4x256xf32>
    %138 = arith.addf %133, %137 : vector<4x256xf32>
    %c0_108 = arith.constant 0 : index
    %c33_109 = arith.constant 33 : index
    %139 = vector.load %arg12[%c0_108, %c33_109] : memref<8x290xf32, #tpu.memory_space<vmem>>, vector<8x256xf32>
    %c7_110 = arith.constant 7 : index
    %c0_111 = arith.constant 0 : index
    %c0_112 = arith.constant 0 : index
    %140 = vector.load %arg4[%c7_110, %c0_111, %c0_112] : memref<9x4x8xf32, #tpu.memory_space<vmem>>, vector<1x4x8xf32>
    %141 = vector.shape_cast %140 : vector<1x4x8xf32> to vector<4x8xf32>
    %cst_113 = arith.constant dense<0.000000e+00> : vector<4x256xf32>
    %142 = tpu.matmul %141, %139, %cst_113 {dimension_numbers = #tpu.dot_dimension_numbers<[1], [0], [0], [1], [0, 0, 1, 1], [], []>} : vector<4x8xf32>, vector<8x256xf32>, vector<4x256xf32> -> vector<4x256xf32>
    %143 = arith.addf %138, %142 : vector<4x256xf32>
    %c0_114 = arith.constant 0 : index
    %c34 = arith.constant 34 : index
    %144 = vector.load %arg11[%c0_114, %c34] : memref<4x290xf32, #tpu.memory_space<vmem>>, vector<4x256xf32>
    %145 = vector.broadcast %42 : vector<1x256xf32> to vector<4x256xf32>
    %146 = arith.mulf %144, %145 : vector<4x256xf32>
    %c8 = arith.constant 8 : index
    %c0_115 = arith.constant 0 : index
    %c0_116 = arith.constant 0 : index
    %147 = vector.load %arg3[%c8, %c0_115, %c0_116] : memref<9x4x4xf32, #tpu.memory_space<vmem>>, vector<1x4x4xf32>
    %148 = vector.shape_cast %147 : vector<1x4x4xf32> to vector<4x4xf32>
    %cst_117 = arith.constant dense<0.000000e+00> : vector<4x256xf32>
    %149 = tpu.matmul %148, %146, %cst_117 {dimension_numbers = #tpu.dot_dimension_numbers<[1], [0], [0], [1], [0, 0, 1, 1], [], []>} : vector<4x4xf32>, vector<4x256xf32>, vector<4x256xf32> -> vector<4x256xf32>
    %150 = arith.addf %143, %149 : vector<4x256xf32>
    %c0_118 = arith.constant 0 : index
    %c34_119 = arith.constant 34 : index
    %151 = vector.load %arg12[%c0_118, %c34_119] : memref<8x290xf32, #tpu.memory_space<vmem>>, vector<8x256xf32>
    %152 = vector.broadcast %42 : vector<1x256xf32> to vector<8x256xf32>
    %153 = arith.mulf %151, %152 : vector<8x256xf32>
    %c8_120 = arith.constant 8 : index
    %c0_121 = arith.constant 0 : index
    %c0_122 = arith.constant 0 : index
    %154 = vector.load %arg4[%c8_120, %c0_121, %c0_122] : memref<9x4x8xf32, #tpu.memory_space<vmem>>, vector<1x4x8xf32>
    %155 = vector.shape_cast %154 : vector<1x4x8xf32> to vector<4x8xf32>
    %cst_123 = arith.constant dense<0.000000e+00> : vector<4x256xf32>
    %156 = tpu.matmul %155, %153, %cst_123 {dimension_numbers = #tpu.dot_dimension_numbers<[1], [0], [0], [1], [0, 0, 1, 1], [], []>} : vector<4x8xf32>, vector<8x256xf32>, vector<4x256xf32> -> vector<4x256xf32>
    %157 = arith.addf %150, %156 : vector<4x256xf32>
    %c0_124 = arith.constant 0 : index
    %c0_125 = arith.constant 0 : index
    %158 = vector.load %arg5[%c0_124, %c0_125] : memref<4x1xf32, #tpu.memory_space<vmem>>, vector<4x1xf32>
    %159 = vector.broadcast %158 : vector<4x1xf32> to vector<4x256xf32>
    %160 = arith.addf %157, %159 : vector<4x256xf32>
    %cst_126 = arith.constant 0.000000e+00 : f32
    %161 = vector.broadcast %cst_126 : f32 to vector<4x256xf32>
    %162 = arith.maximumf %160, %161 : vector<4x256xf32>
    %c0_127 = arith.constant 0 : index
    %c17_128 = arith.constant 17 : index
    %163 = vector.load %arg13[%c0_127, %c17_128] : memref<4x290xf32, #tpu.memory_space<vmem>>, vector<4x256xf32>
    tpu.vector_store %arg13[%c0_127, %c17_128], %162 {strides = array<i32>} : memref<4x290xf32, #tpu.memory_space<vmem>>, vector<4x256xf32>,
    %cst_129 = arith.constant 0.000000e+00 : f32
    %164 = vector.broadcast %cst_129 : f32 to vector<4x256xf32>
    %c0_130 = arith.constant 0 : index
    %c0_131 = arith.constant 0 : index
    %165 = vector.load %arg13[%c0_130, %c0_131] : memref<4x290xf32, #tpu.memory_space<vmem>>, vector<4x256xf32>
    %166 = vector.broadcast %38 : vector<1x256xf32> to vector<4x256xf32>
    %167 = arith.mulf %165, %166 : vector<4x256xf32>
    %c0_132 = arith.constant 0 : index
    %c0_133 = arith.constant 0 : index
    %c0_134 = arith.constant 0 : index
    %168 = vector.load %arg6[%c0_132, %c0_133, %c0_134] : memref<9x4x4xf32, #tpu.memory_space<vmem>>, vector<1x4x4xf32>
    %169 = vector.shape_cast %168 : vector<1x4x4xf32> to vector<4x4xf32>
    %cst_135 = arith.constant dense<0.000000e+00> : vector<4x256xf32>
    %170 = tpu.matmul %169, %167, %cst_135 {dimension_numbers = #tpu.dot_dimension_numbers<[1], [0], [0], [1], [0, 0, 1, 1], [], []>} : vector<4x4xf32>, vector<4x256xf32>, vector<4x256xf32> -> vector<4x256xf32>
    %171 = arith.addf %164, %170 : vector<4x256xf32>
    %c0_136 = arith.constant 0 : index
    %c1_137 = arith.constant 1 : index
    %172 = vector.load %arg13[%c0_136, %c1_137] : memref<4x290xf32, #tpu.memory_space<vmem>>, vector<4x256xf32>
    %c1_138 = arith.constant 1 : index
    %c0_139 = arith.constant 0 : index
    %c0_140 = arith.constant 0 : index
    %173 = vector.load %arg6[%c1_138, %c0_139, %c0_140] : memref<9x4x4xf32, #tpu.memory_space<vmem>>, vector<1x4x4xf32>
    %174 = vector.shape_cast %173 : vector<1x4x4xf32> to vector<4x4xf32>
    %cst_141 = arith.constant dense<0.000000e+00> : vector<4x256xf32>
    %175 = tpu.matmul %174, %172, %cst_141 {dimension_numbers = #tpu.dot_dimension_numbers<[1], [0], [0], [1], [0, 0, 1, 1], [], []>} : vector<4x4xf32>, vector<4x256xf32>, vector<4x256xf32> -> vector<4x256xf32>
    %176 = arith.addf %171, %175 : vector<4x256xf32>
    %c0_142 = arith.constant 0 : index
    %c2_143 = arith.constant 2 : index
    %177 = vector.load %arg13[%c0_142, %c2_143] : memref<4x290xf32, #tpu.memory_space<vmem>>, vector<4x256xf32>
    %178 = vector.broadcast %42 : vector<1x256xf32> to vector<4x256xf32>
    %179 = arith.mulf %177, %178 : vector<4x256xf32>
    %c2_144 = arith.constant 2 : index
    %c0_145 = arith.constant 0 : index
    %c0_146 = arith.constant 0 : index
    %180 = vector.load %arg6[%c2_144, %c0_145, %c0_146] : memref<9x4x4xf32, #tpu.memory_space<vmem>>, vector<1x4x4xf32>
    %181 = vector.shape_cast %180 : vector<1x4x4xf32> to vector<4x4xf32>
    %cst_147 = arith.constant dense<0.000000e+00> : vector<4x256xf32>
    %182 = tpu.matmul %181, %179, %cst_147 {dimension_numbers = #tpu.dot_dimension_numbers<[1], [0], [0], [1], [0, 0, 1, 1], [], []>} : vector<4x4xf32>, vector<4x256xf32>, vector<4x256xf32> -> vector<4x256xf32>
    %183 = arith.addf %176, %182 : vector<4x256xf32>
    %c0_148 = arith.constant 0 : index
    %c16_149 = arith.constant 16 : index
    %184 = vector.load %arg13[%c0_148, %c16_149] : memref<4x290xf32, #tpu.memory_space<vmem>>, vector<4x256xf32>
    %185 = vector.broadcast %38 : vector<1x256xf32> to vector<4x256xf32>
    %186 = arith.mulf %184, %185 : vector<4x256xf32>
    %c3_150 = arith.constant 3 : index
    %c0_151 = arith.constant 0 : index
    %c0_152 = arith.constant 0 : index
    %187 = vector.load %arg6[%c3_150, %c0_151, %c0_152] : memref<9x4x4xf32, #tpu.memory_space<vmem>>, vector<1x4x4xf32>
    %188 = vector.shape_cast %187 : vector<1x4x4xf32> to vector<4x4xf32>
    %cst_153 = arith.constant dense<0.000000e+00> : vector<4x256xf32>
    %189 = tpu.matmul %188, %186, %cst_153 {dimension_numbers = #tpu.dot_dimension_numbers<[1], [0], [0], [1], [0, 0, 1, 1], [], []>} : vector<4x4xf32>, vector<4x256xf32>, vector<4x256xf32> -> vector<4x256xf32>
    %190 = arith.addf %183, %189 : vector<4x256xf32>
    %c0_154 = arith.constant 0 : index
    %c17_155 = arith.constant 17 : index
    %191 = vector.load %arg13[%c0_154, %c17_155] : memref<4x290xf32, #tpu.memory_space<vmem>>, vector<4x256xf32>
    %c4_156 = arith.constant 4 : index
    %c0_157 = arith.constant 0 : index
    %c0_158 = arith.constant 0 : index
    %192 = vector.load %arg6[%c4_156, %c0_157, %c0_158] : memref<9x4x4xf32, #tpu.memory_space<vmem>>, vector<1x4x4xf32>
    %193 = vector.shape_cast %192 : vector<1x4x4xf32> to vector<4x4xf32>
    %cst_159 = arith.constant dense<0.000000e+00> : vector<4x256xf32>
    %194 = tpu.matmul %193, %191, %cst_159 {dimension_numbers = #tpu.dot_dimension_numbers<[1], [0], [0], [1], [0, 0, 1, 1], [], []>} : vector<4x4xf32>, vector<4x256xf32>, vector<4x256xf32> -> vector<4x256xf32>
    %195 = arith.addf %190, %194 : vector<4x256xf32>
    %c0_160 = arith.constant 0 : index
    %c18_161 = arith.constant 18 : index
    %196 = vector.load %arg13[%c0_160, %c18_161] : memref<4x290xf32, #tpu.memory_space<vmem>>, vector<4x256xf32>
    %197 = vector.broadcast %42 : vector<1x256xf32> to vector<4x256xf32>
    %198 = arith.mulf %196, %197 : vector<4x256xf32>
    %c5_162 = arith.constant 5 : index
    %c0_163 = arith.constant 0 : index
    %c0_164 = arith.constant 0 : index
    %199 = vector.load %arg6[%c5_162, %c0_163, %c0_164] : memref<9x4x4xf32, #tpu.memory_space<vmem>>, vector<1x4x4xf32>
    %200 = vector.shape_cast %199 : vector<1x4x4xf32> to vector<4x4xf32>
    %cst_165 = arith.constant dense<0.000000e+00> : vector<4x256xf32>
    %201 = tpu.matmul %200, %198, %cst_165 {dimension_numbers = #tpu.dot_dimension_numbers<[1], [0], [0], [1], [0, 0, 1, 1], [], []>} : vector<4x4xf32>, vector<4x256xf32>, vector<4x256xf32> -> vector<4x256xf32>
    %202 = arith.addf %195, %201 : vector<4x256xf32>
    %c0_166 = arith.constant 0 : index
    %c32_167 = arith.constant 32 : index
    %203 = vector.load %arg13[%c0_166, %c32_167] : memref<4x290xf32, #tpu.memory_space<vmem>>, vector<4x256xf32>
    %204 = vector.broadcast %38 : vector<1x256xf32> to vector<4x256xf32>
    %205 = arith.mulf %203, %204 : vector<4x256xf32>
    %c6_168 = arith.constant 6 : index
    %c0_169 = arith.constant 0 : index
    %c0_170 = arith.constant 0 : index
    %206 = vector.load %arg6[%c6_168, %c0_169, %c0_170] : memref<9x4x4xf32, #tpu.memory_space<vmem>>, vector<1x4x4xf32>
    %207 = vector.shape_cast %206 : vector<1x4x4xf32> to vector<4x4xf32>
    %cst_171 = arith.constant dense<0.000000e+00> : vector<4x256xf32>
    %208 = tpu.matmul %207, %205, %cst_171 {dimension_numbers = #tpu.dot_dimension_numbers<[1], [0], [0], [1], [0, 0, 1, 1], [], []>} : vector<4x4xf32>, vector<4x256xf32>, vector<4x256xf32> -> vector<4x256xf32>
    %209 = arith.addf %202, %208 : vector<4x256xf32>
    %c0_172 = arith.constant 0 : index
    %c33_173 = arith.constant 33 : index
    %210 = vector.load %arg13[%c0_172, %c33_173] : memref<4x290xf32, #tpu.memory_space<vmem>>, vector<4x256xf32>
    %c7_174 = arith.constant 7 : index
    %c0_175 = arith.constant 0 : index
    %c0_176 = arith.constant 0 : index
    %211 = vector.load %arg6[%c7_174, %c0_175, %c0_176] : memref<9x4x4xf32, #tpu.memory_space<vmem>>, vector<1x4x4xf32>
    %212 = vector.shape_cast %211 : vector<1x4x4xf32> to vector<4x4xf32>
    %cst_177 = arith.constant dense<0.000000e+00> : vector<4x256xf32>
    %213 = tpu.matmul %212, %210, %cst_177 {dimension_numbers = #tpu.dot_dimension_numbers<[1], [0], [0], [1], [0, 0, 1, 1], [], []>} : vector<4x4xf32>, vector<4x256xf32>, vector<4x256xf32> -> vector<4x256xf32>
    %214 = arith.addf %209, %213 : vector<4x256xf32>
    %c0_178 = arith.constant 0 : index
    %c34_179 = arith.constant 34 : index
    %215 = vector.load %arg13[%c0_178, %c34_179] : memref<4x290xf32, #tpu.memory_space<vmem>>, vector<4x256xf32>
    %216 = vector.broadcast %42 : vector<1x256xf32> to vector<4x256xf32>
    %217 = arith.mulf %215, %216 : vector<4x256xf32>
    %c8_180 = arith.constant 8 : index
    %c0_181 = arith.constant 0 : index
    %c0_182 = arith.constant 0 : index
    %218 = vector.load %arg6[%c8_180, %c0_181, %c0_182] : memref<9x4x4xf32, #tpu.memory_space<vmem>>, vector<1x4x4xf32>
    %219 = vector.shape_cast %218 : vector<1x4x4xf32> to vector<4x4xf32>
    %cst_183 = arith.constant dense<0.000000e+00> : vector<4x256xf32>
    %220 = tpu.matmul %219, %217, %cst_183 {dimension_numbers = #tpu.dot_dimension_numbers<[1], [0], [0], [1], [0, 0, 1, 1], [], []>} : vector<4x4xf32>, vector<4x256xf32>, vector<4x256xf32> -> vector<4x256xf32>
    %221 = arith.addf %214, %220 : vector<4x256xf32>
    %c0_184 = arith.constant 0 : index
    %c0_185 = arith.constant 0 : index
    %222 = vector.load %arg7[%c0_184, %c0_185] : memref<4x1xf32, #tpu.memory_space<vmem>>, vector<4x1xf32>
    %223 = vector.broadcast %222 : vector<4x1xf32> to vector<4x256xf32>
    %224 = arith.addf %221, %223 : vector<4x256xf32>
    %cst_186 = arith.constant 0.000000e+00 : f32
    %225 = vector.broadcast %cst_186 : f32 to vector<4x256xf32>
    %226 = arith.maximumf %224, %225 : vector<4x256xf32>
    %c0_187 = arith.constant 0 : index
    %c17_188 = arith.constant 17 : index
    %227 = vector.load %arg13[%c0_187, %c17_188] : memref<4x290xf32, #tpu.memory_space<vmem>>, vector<4x256xf32>
    tpu.vector_store %arg13[%c0_187, %c17_188], %226 {strides = array<i32>} : memref<4x290xf32, #tpu.memory_space<vmem>>, vector<4x256xf32>,
    %cst_189 = arith.constant 0.000000e+00 : f32
    %228 = vector.broadcast %cst_189 : f32 to vector<4x256xf32>
    %c0_190 = arith.constant 0 : index
    %c0_191 = arith.constant 0 : index
    %229 = vector.load %arg13[%c0_190, %c0_191] : memref<4x290xf32, #tpu.memory_space<vmem>>, vector<4x256xf32>
    %230 = vector.broadcast %38 : vector<1x256xf32> to vector<4x256xf32>
    %231 = arith.mulf %229, %230 : vector<4x256xf32>
    %c0_192 = arith.constant 0 : index
    %c0_193 = arith.constant 0 : index
    %c0_194 = arith.constant 0 : index
    %232 = vector.load %arg8[%c0_192, %c0_193, %c0_194] : memref<9x4x4xf32, #tpu.memory_space<vmem>>, vector<1x4x4xf32>
    %233 = vector.shape_cast %232 : vector<1x4x4xf32> to vector<4x4xf32>
    %cst_195 = arith.constant dense<0.000000e+00> : vector<4x256xf32>
    %234 = tpu.matmul %233, %231, %cst_195 {dimension_numbers = #tpu.dot_dimension_numbers<[1], [0], [0], [1], [0, 0, 1, 1], [], []>} : vector<4x4xf32>, vector<4x256xf32>, vector<4x256xf32> -> vector<4x256xf32>
    %235 = arith.addf %228, %234 : vector<4x256xf32>
    %c0_196 = arith.constant 0 : index
    %c1_197 = arith.constant 1 : index
    %236 = vector.load %arg13[%c0_196, %c1_197] : memref<4x290xf32, #tpu.memory_space<vmem>>, vector<4x256xf32>
    %c1_198 = arith.constant 1 : index
    %c0_199 = arith.constant 0 : index
    %c0_200 = arith.constant 0 : index
    %237 = vector.load %arg8[%c1_198, %c0_199, %c0_200] : memref<9x4x4xf32, #tpu.memory_space<vmem>>, vector<1x4x4xf32>
    %238 = vector.shape_cast %237 : vector<1x4x4xf32> to vector<4x4xf32>
    %cst_201 = arith.constant dense<0.000000e+00> : vector<4x256xf32>
    %239 = tpu.matmul %238, %236, %cst_201 {dimension_numbers = #tpu.dot_dimension_numbers<[1], [0], [0], [1], [0, 0, 1, 1], [], []>} : vector<4x4xf32>, vector<4x256xf32>, vector<4x256xf32> -> vector<4x256xf32>
    %240 = arith.addf %235, %239 : vector<4x256xf32>
    %c0_202 = arith.constant 0 : index
    %c2_203 = arith.constant 2 : index
    %241 = vector.load %arg13[%c0_202, %c2_203] : memref<4x290xf32, #tpu.memory_space<vmem>>, vector<4x256xf32>
    %242 = vector.broadcast %42 : vector<1x256xf32> to vector<4x256xf32>
    %243 = arith.mulf %241, %242 : vector<4x256xf32>
    %c2_204 = arith.constant 2 : index
    %c0_205 = arith.constant 0 : index
    %c0_206 = arith.constant 0 : index
    %244 = vector.load %arg8[%c2_204, %c0_205, %c0_206] : memref<9x4x4xf32, #tpu.memory_space<vmem>>, vector<1x4x4xf32>
    %245 = vector.shape_cast %244 : vector<1x4x4xf32> to vector<4x4xf32>
    %cst_207 = arith.constant dense<0.000000e+00> : vector<4x256xf32>
    %246 = tpu.matmul %245, %243, %cst_207 {dimension_numbers = #tpu.dot_dimension_numbers<[1], [0], [0], [1], [0, 0, 1, 1], [], []>} : vector<4x4xf32>, vector<4x256xf32>, vector<4x256xf32> -> vector<4x256xf32>
    %247 = arith.addf %240, %246 : vector<4x256xf32>
    %c0_208 = arith.constant 0 : index
    %c16_209 = arith.constant 16 : index
    %248 = vector.load %arg13[%c0_208, %c16_209] : memref<4x290xf32, #tpu.memory_space<vmem>>, vector<4x256xf32>
    %249 = vector.broadcast %38 : vector<1x256xf32> to vector<4x256xf32>
    %250 = arith.mulf %248, %249 : vector<4x256xf32>
    %c3_210 = arith.constant 3 : index
    %c0_211 = arith.constant 0 : index
    %c0_212 = arith.constant 0 : index
    %251 = vector.load %arg8[%c3_210, %c0_211, %c0_212] : memref<9x4x4xf32, #tpu.memory_space<vmem>>, vector<1x4x4xf32>
    %252 = vector.shape_cast %251 : vector<1x4x4xf32> to vector<4x4xf32>
    %cst_213 = arith.constant dense<0.000000e+00> : vector<4x256xf32>
    %253 = tpu.matmul %252, %250, %cst_213 {dimension_numbers = #tpu.dot_dimension_numbers<[1], [0], [0], [1], [0, 0, 1, 1], [], []>} : vector<4x4xf32>, vector<4x256xf32>, vector<4x256xf32> -> vector<4x256xf32>
    %254 = arith.addf %247, %253 : vector<4x256xf32>
    %c0_214 = arith.constant 0 : index
    %c17_215 = arith.constant 17 : index
    %255 = vector.load %arg13[%c0_214, %c17_215] : memref<4x290xf32, #tpu.memory_space<vmem>>, vector<4x256xf32>
    %c4_216 = arith.constant 4 : index
    %c0_217 = arith.constant 0 : index
    %c0_218 = arith.constant 0 : index
    %256 = vector.load %arg8[%c4_216, %c0_217, %c0_218] : memref<9x4x4xf32, #tpu.memory_space<vmem>>, vector<1x4x4xf32>
    %257 = vector.shape_cast %256 : vector<1x4x4xf32> to vector<4x4xf32>
    %cst_219 = arith.constant dense<0.000000e+00> : vector<4x256xf32>
    %258 = tpu.matmul %257, %255, %cst_219 {dimension_numbers = #tpu.dot_dimension_numbers<[1], [0], [0], [1], [0, 0, 1, 1], [], []>} : vector<4x4xf32>, vector<4x256xf32>, vector<4x256xf32> -> vector<4x256xf32>
    %259 = arith.addf %254, %258 : vector<4x256xf32>
    %c0_220 = arith.constant 0 : index
    %c18_221 = arith.constant 18 : index
    %260 = vector.load %arg13[%c0_220, %c18_221] : memref<4x290xf32, #tpu.memory_space<vmem>>, vector<4x256xf32>
    %261 = vector.broadcast %42 : vector<1x256xf32> to vector<4x256xf32>
    %262 = arith.mulf %260, %261 : vector<4x256xf32>
    %c5_222 = arith.constant 5 : index
    %c0_223 = arith.constant 0 : index
    %c0_224 = arith.constant 0 : index
    %263 = vector.load %arg8[%c5_222, %c0_223, %c0_224] : memref<9x4x4xf32, #tpu.memory_space<vmem>>, vector<1x4x4xf32>
    %264 = vector.shape_cast %263 : vector<1x4x4xf32> to vector<4x4xf32>
    %cst_225 = arith.constant dense<0.000000e+00> : vector<4x256xf32>
    %265 = tpu.matmul %264, %262, %cst_225 {dimension_numbers = #tpu.dot_dimension_numbers<[1], [0], [0], [1], [0, 0, 1, 1], [], []>} : vector<4x4xf32>, vector<4x256xf32>, vector<4x256xf32> -> vector<4x256xf32>
    %266 = arith.addf %259, %265 : vector<4x256xf32>
    %c0_226 = arith.constant 0 : index
    %c32_227 = arith.constant 32 : index
    %267 = vector.load %arg13[%c0_226, %c32_227] : memref<4x290xf32, #tpu.memory_space<vmem>>, vector<4x256xf32>
    %268 = vector.broadcast %38 : vector<1x256xf32> to vector<4x256xf32>
    %269 = arith.mulf %267, %268 : vector<4x256xf32>
    %c6_228 = arith.constant 6 : index
    %c0_229 = arith.constant 0 : index
    %c0_230 = arith.constant 0 : index
    %270 = vector.load %arg8[%c6_228, %c0_229, %c0_230] : memref<9x4x4xf32, #tpu.memory_space<vmem>>, vector<1x4x4xf32>
    %271 = vector.shape_cast %270 : vector<1x4x4xf32> to vector<4x4xf32>
    %cst_231 = arith.constant dense<0.000000e+00> : vector<4x256xf32>
    %272 = tpu.matmul %271, %269, %cst_231 {dimension_numbers = #tpu.dot_dimension_numbers<[1], [0], [0], [1], [0, 0, 1, 1], [], []>} : vector<4x4xf32>, vector<4x256xf32>, vector<4x256xf32> -> vector<4x256xf32>
    %273 = arith.addf %266, %272 : vector<4x256xf32>
    %c0_232 = arith.constant 0 : index
    %c33_233 = arith.constant 33 : index
    %274 = vector.load %arg13[%c0_232, %c33_233] : memref<4x290xf32, #tpu.memory_space<vmem>>, vector<4x256xf32>
    %c7_234 = arith.constant 7 : index
    %c0_235 = arith.constant 0 : index
    %c0_236 = arith.constant 0 : index
    %275 = vector.load %arg8[%c7_234, %c0_235, %c0_236] : memref<9x4x4xf32, #tpu.memory_space<vmem>>, vector<1x4x4xf32>
    %276 = vector.shape_cast %275 : vector<1x4x4xf32> to vector<4x4xf32>
    %cst_237 = arith.constant dense<0.000000e+00> : vector<4x256xf32>
    %277 = tpu.matmul %276, %274, %cst_237 {dimension_numbers = #tpu.dot_dimension_numbers<[1], [0], [0], [1], [0, 0, 1, 1], [], []>} : vector<4x4xf32>, vector<4x256xf32>, vector<4x256xf32> -> vector<4x256xf32>
    %278 = arith.addf %273, %277 : vector<4x256xf32>
    %c0_238 = arith.constant 0 : index
    %c34_239 = arith.constant 34 : index
    %279 = vector.load %arg13[%c0_238, %c34_239] : memref<4x290xf32, #tpu.memory_space<vmem>>, vector<4x256xf32>
    %280 = vector.broadcast %42 : vector<1x256xf32> to vector<4x256xf32>
    %281 = arith.mulf %279, %280 : vector<4x256xf32>
    %c8_240 = arith.constant 8 : index
    %c0_241 = arith.constant 0 : index
    %c0_242 = arith.constant 0 : index
    %282 = vector.load %arg8[%c8_240, %c0_241, %c0_242] : memref<9x4x4xf32, #tpu.memory_space<vmem>>, vector<1x4x4xf32>
    %283 = vector.shape_cast %282 : vector<1x4x4xf32> to vector<4x4xf32>
    %cst_243 = arith.constant dense<0.000000e+00> : vector<4x256xf32>
    %284 = tpu.matmul %283, %281, %cst_243 {dimension_numbers = #tpu.dot_dimension_numbers<[1], [0], [0], [1], [0, 0, 1, 1], [], []>} : vector<4x4xf32>, vector<4x256xf32>, vector<4x256xf32> -> vector<4x256xf32>
    %285 = arith.addf %278, %284 : vector<4x256xf32>
    %c0_244 = arith.constant 0 : index
    %c0_245 = arith.constant 0 : index
    %286 = vector.load %arg9[%c0_244, %c0_245] : memref<4x1xf32, #tpu.memory_space<vmem>>, vector<4x1xf32>
    %287 = vector.broadcast %286 : vector<4x1xf32> to vector<4x256xf32>
    %288 = arith.addf %285, %287 : vector<4x256xf32>
    %cst_246 = arith.constant 0.000000e+00 : f32
    %289 = vector.broadcast %cst_246 : f32 to vector<4x256xf32>
    %290 = arith.maximumf %288, %289 : vector<4x256xf32>
    %c0_247 = arith.constant 0 : index
    %c0_248 = arith.constant 0 : index
    %c0_249 = arith.constant 0 : index
    %291 = vector.load %arg10[%c0_247, %c0_248, %c0_249] : memref<1x4x256xf32, #tpu.memory_space<vmem>>, vector<1x4x256xf32>
    %292 = vector.shape_cast %291 : vector<1x4x256xf32> to vector<4x256xf32>
    %293 = vector.shape_cast %290 : vector<4x256xf32> to vector<1x4x256xf32>
    tpu.vector_store %arg10[%c0_247, %c0_248, %c0_249], %293 {strides = array<i32>} : memref<1x4x256xf32, #tpu.memory_space<vmem>>, vector<1x4x256xf32>,
    return
  }
  func.func @transform_0(%arg0: i32) -> (i32, i32, i32) {
    %c0_i32 = arith.constant 0 : i32
    %c0_i32_0 = arith.constant 0 : i32
    %c0_i32_1 = arith.constant 0 : i32
    return %arg0, %c0_i32, %c0_i32_0 : i32, i32, i32
  }
  func.func @transform_1(%arg0: i32) -> (i32, i32, i32) {
    %c0_i32 = arith.constant 0 : i32
    %c0_i32_0 = arith.constant 0 : i32
    %c0_i32_1 = arith.constant 0 : i32
    return %arg0, %c0_i32, %c0_i32_0 : i32, i32, i32
  }
  func.func @transform_2(%arg0: i32) -> (i32, i32, i32) {
    %c0_i32 = arith.constant 0 : i32
    %c0_i32_0 = arith.constant 0 : i32
    %c0_i32_1 = arith.constant 0 : i32
    %c0_i32_2 = arith.constant 0 : i32
    return %c0_i32, %c0_i32_0, %c0_i32_1 : i32, i32, i32
  }
  func.func @transform_3(%arg0: i32) -> (i32, i32, i32) {
    %c0_i32 = arith.constant 0 : i32
    %c0_i32_0 = arith.constant 0 : i32
    %c0_i32_1 = arith.constant 0 : i32
    %c0_i32_2 = arith.constant 0 : i32
    return %c0_i32, %c0_i32_0, %c0_i32_1 : i32, i32, i32
  }
  func.func @transform_4(%arg0: i32) -> (i32, i32) {
    %c0_i32 = arith.constant 0 : i32
    %c0_i32_0 = arith.constant 0 : i32
    %c0_i32_1 = arith.constant 0 : i32
    return %c0_i32, %c0_i32_0 : i32, i32
  }
  func.func @transform_5(%arg0: i32) -> (i32, i32, i32) {
    %c0_i32 = arith.constant 0 : i32
    %c0_i32_0 = arith.constant 0 : i32
    %c0_i32_1 = arith.constant 0 : i32
    %c0_i32_2 = arith.constant 0 : i32
    return %c0_i32, %c0_i32_0, %c0_i32_1 : i32, i32, i32
  }
  func.func @transform_6(%arg0: i32) -> (i32, i32) {
    %c0_i32 = arith.constant 0 : i32
    %c0_i32_0 = arith.constant 0 : i32
    %c0_i32_1 = arith.constant 0 : i32
    return %c0_i32, %c0_i32_0 : i32, i32
  }
  func.func @transform_7(%arg0: i32) -> (i32, i32, i32) {
    %c0_i32 = arith.constant 0 : i32
    %c0_i32_0 = arith.constant 0 : i32
    %c0_i32_1 = arith.constant 0 : i32
    %c0_i32_2 = arith.constant 0 : i32
    return %c0_i32, %c0_i32_0, %c0_i32_1 : i32, i32, i32
  }
  func.func @transform_8(%arg0: i32) -> (i32, i32) {
    %c0_i32 = arith.constant 0 : i32
    %c0_i32_0 = arith.constant 0 : i32
    %c0_i32_1 = arith.constant 0 : i32
    return %c0_i32, %c0_i32_0 : i32, i32
  }
  func.func @transform_9(%arg0: i32) -> (i32, i32, i32) {
    %c0_i32 = arith.constant 0 : i32
    %c0_i32_0 = arith.constant 0 : i32
    %c0_i32_1 = arith.constant 0 : i32
    return %arg0, %c0_i32, %c0_i32_0 : i32, i32, i32
  }
}

</mosaic_0001>

<bundles_post_ra>
// kernel: tile.8
= control target key start
LH: loop header
LB: loop body
LE: loop exit
PB: predicated region body
PF: predicated region fallthrough
CT: control target
= control target key end

     0   :  { %s22_s0 = inlined_call_operand.vmem [shape: f32[4], index: 0, kind: input, shape index: {}]   ;;  %s23_s1 = inlined_call_operand.vmem [shape: f32[4,4], index: 1, kind: output, shape index: {}]  }
   0x1   :  { %v4_v0 = vld [vmem:[%s22_s0] ss:$0 sm:$0xff] }
   0x2   :  { %5 = vst [vmem:[%s23_s1] sm:$0xf] %v4_v0 }

// kernel: tile.0
= control target key start
LH: loop header
LB: loop body
LE: loop exit
PB: predicated region body
PF: predicated region fallthrough
CT: control target
= control target key end

     0   :  { %s34_s8 = smov 125   ;;  %vm7_vm0 = vcmask 7168   ;;  %s35_s11 = smov 126   ;;  %s61_s0 = inlined_call_operand.vmem [shape: f32[4,4], index: 0, kind: input, shape index: {}]   ;;  %s62_s1 = inlined_call_operand.vmem [shape: f32[16,1], index: 1, kind: output, shape index: {}]  }
   0x1   :  { %v4_v0 = vld [vmem:[%s61_s0] sm:$0xf]  ;;  %s33_s0 = smov 127  }
   0x2   :  { %5 = vst [vmem:[#allocation0] sm:$0xf] %v4_v0 }
   0x9   :  { %v9_v1 = vld [vmem:[#allocation0] sm:$0xf]  }
   0xa   :  { %v21_v2 = vld [vmem:[#allocation0] sm:$0xf]   ;;  %10 = vrot.lane.b32.xlu0 %v9_v1, %s33_s0 }
   0xb   :  { %22 = vrot.lane.b32.xlu1 %v21_v2, %s34_s8  ;;  %v6_v3 = vld [vmem:[#allocation0] sm:$0xf]  }
   0xc   :  { %v15_v4 = vld [vmem:[#allocation0] sm:$0xf]   ;;  %8 = vst.msk [vmem:[%s62_s1] ss:$4 sm:$0xf] %vm7_vm0, %v6_v3  }
   0xe   :  { %16 = vrot.lane.b32.xlu0 %v15_v4, %s35_s11 }
  0x7c   :  { %v11_v5 = vpop.permute.xlu0 %10  }
  0x7d   :  { %v23_v6 = vpop.permute.xlu1 %22   ;;  %27 = vst.msk [vmem:[%s62_s1 + $0x1] ss:$4 sm:$0xf] %vm7_vm0, %v11_v5  }
  0x7e   :  { %29 = vst.msk [vmem:[%s62_s1 + $0x3] ss:$4 sm:$0xf] %vm7_vm0, %v23_v6  }
  0x80   :  { %v17_v7 = vpop.permute.xlu0 %16  }
  0x81   :  { %28 = vst.msk [vmem:[%s62_s1 + $0x2] ss:$4 sm:$0xf] %vm7_vm0, %v17_v7  }

// kernel: deconv_block_forward.2
= control target key start
LH: loop header
LB: loop body
LE: loop exit
PB: predicated region body
PF: predicated region fallthrough
CT: control target
= control target key end

     0   :  { %s383_s12 = smov 0   ;;  %s412_s0 = inlined_call_operand.vmem [shape: f32[2,8,64], index: 0, kind: input, shape index: {}]   ;;  %s413_s1 = inlined_call_operand.vmem [shape: f32[16,8], index: 1, kind: input, shape index: {}]   ;;  %s414_s2 = inlined_call_operand.vmem [shape: f32[16,1], index: 2, kind: input, shape index: {}]   ;;  %s415_s3 = inlined_call_operand.vmem [shape: f32[2,16,64], index: 3, kind: output, shape index: {}]  }
   0x1 LB: > { %s323_s13 = sadd.s32 4294967295, %s360_s12   ;;  %p327_p0 = scmp.ge.s32.totalorder %s360_s12, 1  ;;  %s360_s12 = sphi %s383_s12, %s13_s12  }
   0x2   : > { %p136_p1 = scmp.lt.s32.totalorder %s360_s12, 3 }
   0x4   : > { %p137_p2 = pnand %p327_p0, %p136_p1 }
   0x5   : > { %p159_p3 = scmp.lt.s32.totalorder (!%p137_p2), %s323_s13, 1  ;;  %v168_v0 = vld [vmem:[%s413_s1] sm:$0xff] (!%p137_p2)  ;;  %vm183_vm0 = vcmask (!%p137_p2), 64512   ;;  %v362_v2 = vmov (!%p137_p2), 0   ;;  %v172_v3 = vld [vmem:[%s414_s2 + $0x8] sm:$0xff] (!%p137_p2)  ;;  %vm265_vm1 = vcmask (!%p137_p2), 523264  }
   0x6   : > { %140 = sbr.rel (%p137_p2) target bundleno = 235 (0xeb), region = 32  ;;  %v171_v1 = vld [vmem:[%s414_s2] sm:$0xff] (!%p137_p2)  ;;  %341 = vmatprep.mubr.msk.f32.mxu0 (!%p137_p2), %vm183_vm0, %v168_v0  ;;  %353 = vset.pattern.permute.xlu0 (!%p137_p2), %v362_v2  ;;  %v169_v5 = vld [vmem:[%s413_s1 + $0x8] sm:$0xff] (!%p137_p2) }
   0x7   : > { %175 = vperm.xlu0 (!%p137_p2), %353, %v171_v1  }
   0xb   : > { %180 = vperm.xlu0 (!%p137_p2), %353, %v172_v3  }
   0xd   : > { %s417_s13 = smov (!%p159_p3, %s323_s13), 1 }
   0xe   : > { %s328_s20 = sshll.u32 %s417_s13, 3  ;;  %s335_s26 = sshll.u32 %s417_s13, 4 }
   0xf   : > { %s162_s23 = scalar_lea.vmem %s412_s0, %s328_s20  ;;  %s167_s29 = scalar_lea.vmem %s415_s3, %s335_s26 }
  0x10   : > { %v170_v4 = vld [vmem:[%s162_s23] sm:$0xff] }
  0x11   : > { %339 = vmatprep.subr.mxu0 %v170_v4 }
  0x12   : > { %340 = vmatpush3.msra.mxu0 %v170_v4 }
  0x13   : > { %342 = vmatmul.mubr.msk.f32.vlgmr.msra.gmra.mrb[0].mxu0 %vm183_vm0, %v169_v5 }
  0x86   : > { %v176_v6 = vpop.permute.xlu0 %175 }
  0x8a   : > { %v181_v7 = vpop.permute.xlu0 %180 }
  0xe6   : > { %v343_v8 = vpop.f32.mrb[0].mxu0 }
  0xe7   : > { %v262_v9 = vadd.f32 %v343_v8, %v181_v7  ;;  %v256_v10 = vpop.f32.mrb[1].mxu0 }
  0xe8   : > { %v257_v11 = vadd.f32 %v256_v10, %v176_v6 }
  0xe9   : > { %267 = vst.msk [vmem:[%s167_s29 + $0x8] sm:$0xff] %vm265_vm1, %v262_v9 }
  0xea   : > { %266 = vst.msk [vmem:[%s167_s29] sm:$0xff] %vm265_vm1, %v257_v11 }
  0xeb PF: > { %s13_s12 = sadd.s32 1, %s360_s12  }
  0xec   : > { %p10_p4 = scmp.ge.s32.totalorder %s13_s12, 4  }
  0xee   :  { %12 = sbr.rel (!%p10_p4) target bundleno = 1 (0x1), region = 62 }

// kernel: deconv_block_forward.3
= control target key start
LH: loop header
LB: loop body
LE: loop exit
PB: predicated region body
PF: predicated region fallthrough
CT: control target
= control target key end

     0   :  { %s4383_s30 = smov 0   ;;  %s4990_s0 = inlined_call_operand.vmem [shape: f32[2,4,256], index: 0, kind: input, shape index: {}]   ;;  %s4991_s1 = inlined_call_operand.vmem [shape: f32[2,8,256], index: 1, kind: input, shape index: {}]   ;;  %s4992_s2 = inlined_call_operand.vmem [shape: f32[9,4,4], index: 2, kind: input, shape index: {}]   ;;  %s4993_s3 = inlined_call_operand.vmem [shape: f32[9,4,8], index: 3, kind: input, shape index: {}]   ;;  %s4994_s4 = inlined_call_operand.vmem [shape: f32[4,1], index: 4, kind: input, shape index: {}]   ;;  %s4995_s5 = inlined_call_operand.vmem [shape: f32[9,4,4], index: 5, kind: input, shape index: {}]   ;;  %s4996_s6 = inlined_call_operand.vmem [shape: f32[4,1], index: 6, kind: input, shape index: {}]   ;;  %s4997_s7 = inlined_call_operand.vmem [shape: f32[9,4,4], index: 7, kind: input, shape index: {}]   ;;  %s4998_s8 = inlined_call_operand.vmem [shape: f32[4,1], index: 8, kind: input, shape index: {}]   ;;  %s4999_s9 = inlined_call_operand.vmem [shape: f32[2,4,256], index: 9, kind: output, shape index: {}]  }
   0x1 LB: > { %s4047_s10 = sadd.s32 4294967295, %s4315_s30   ;;  %p4051_p0 = scmp.ge.s32.totalorder %s4315_s30, 1  ;;  %s4315_s30 = sphi %s4383_s30, %s19_s30  }
   0x2   : > { %p297_p1 = scmp.lt.s32.totalorder %s4315_s30, 3 }
   0x4   : > { %p298_p2 = pnand %p4051_p0, %p297_p1 }
   0x5   : > { %p338_p3 = scmp.lt.s32.totalorder (!%p298_p2), %s4047_s10, 1  ;;  %v392_v0 = vlaneseq (!%p298_p2)  ;;  %vm366_vm0 = vcmask (!%p298_p2), 134144   ;;  %vm385_vm1 = vcmask (!%p298_p2), 273544   ;;  %v4317_v1 = vmov (!%p298_p2), 0.0   ;;  %s4318_s19 = smov (!%p298_p2), 17  }
   0x6   : > { %301 = sbr.rel (%p298_p2) target bundleno = 1733 (0x6c5), region = 56  ;;  %511 = vmatprep.mubr.f32.mxu0 (!%p298_p2), %v4317_v1  ;;  %2332 = vmatprep.mubr.f32.mxu1 (!%p298_p2), %v4317_v1  ;;  %390 = vst.msk [vmem:[#allocation4] sm:$0xf] (!%p298_p2), %vm366_vm0, %v4317_v1  ;;  %s4319_s20 = smov (!%p298_p2), 2   ;;  %vm362_vm6 = vcmask (!%p298_p2), 1043592   ;;  %vm363_vm7 = vcmask (!%p298_p2), 1047556  }
   0x7   : > { %v393_v2 = vand.u32 (!%p298_p2), 127, %v392_v0  ;;  %391 = vst.msk [vmem:[#allocation4 + $0x8] sm:$0xf] (!%p298_p2), %vm385_vm1, %v4317_v1  ;;  %s4320_s21 = smov (!%p298_p2), 16   ;;  %s4321_s22 = smov (!%p298_p2), 18   ;;  %vm358_vm8 = vcmask (!%p298_p2), 138240   ;;  %vm4430_vm10 = vmor (!%p298_p2), %vm363_vm7, %vm362_vm6 }
   0x8   : > { %vm388_vm9 = vcmask (!%p298_p2), 277640   ;;  %vm380_vm11 = vcmask (!%p298_p2), 1047688   ;;  %s4322_s23 = smov (!%p298_p2), 127   ;;  %vm524_vm12 = vcmask (!%p298_p2), 1043456   ;;  %v442_v31 = vld [vmem:[%s4993_s3] sm:$0xf] (!%p298_p2) }
   0x9   : > { %v394_v3 = vadd.s32 (!%p298_p2), 128, %v393_v2  ;;  %v399_v4 = vand.u32 (!%p298_p2), 15, %v393_v2  ;;  %vm443_vm13 = vcmask (!%p298_p2), 64512   ;;  %vm798_vm14 = vcmask (!%p298_p2), 15360   ;;  %v437_v39 = vld [vmem:[%s4992_s2] sm:$0xf] (!%p298_p2) }
   0xa   : > { %vm520_vm15 = vcmask (!%p298_p2), 31744   ;;  %s4323_s28 = smov (!%p298_p2), 32   ;;  %s4324_s29 = smov (!%p298_p2), 126   ;;  %vm1025_vm6 = vcmask (!%p298_p2), 916480   ;;  %vm2018_vm7 = vcmask (!%p298_p2), 277504  }
   0xb   : > { %v406_v6 = vand.u32 (!%p298_p2), 15, %v394_v3  ;;  %vm419_vm2 = vcmp.ne.s32.totalorder (!%p298_p2), %v399_v4, 0  ;;  %vm425_vm3 = vcmp.ne.s32.totalorder (!%p298_p2), %v399_v4, 15  ;;  %s4326_s13 = smov (!%p298_p2), 34   ;;  %s4327_s14 = smov (!%p298_p2), 111  }
   0xc   : > { %v4060_v8 = vsel (!%p298_p2), %vm425_vm3, 1.0, %v4317_v1  ;;  %v4058_v10 = vsel (!%p298_p2), %vm419_vm2, 1.0, %v4317_v1  ;;  %vm1408_vm2 = vcmask (!%p298_p2), 146432   ;;  %vm613_vm3 = vcmask (!%p298_p2), 1039360   ;;  %s4329_s24 = smov (!%p298_p2), 96  }
   0xd   : > { %s5003_s10 = smov (!%p338_p3, %s4047_s10), 1  ;;  %vm420_vm4 = vcmp.ne.s32.totalorder %v406_v6, 0  ;;  %vm426_vm5 = vcmp.ne.s32.totalorder %v406_v6, 15 }
   0xe   : > { %s4186_s11 = sshll.u32 %s5003_s10, 3  ;;  %s4187_s12 = sshll.u32 %s5003_s10, 4  ;;  %v4059_v11 = vsel %vm420_vm4, 1.0, %v4317_v1  ;;  %v4061_v12 = vsel %vm426_vm5, 1.0, %v4317_v1  ;;  %vm1618_vm4 = vcmask 261120   ;;  %vm815_vm5 = vcmask 1031168  }
   0xf   : > { %s342_s15 = scalar_lea.vmem %s4990_s0, %s4186_s11  ;;  %s347_s18 = scalar_lea.vmem %s4991_s1, %s4187_s12  ;;  %v4415_v13 = vcombine.low %v4060_v8, %v4061_v12  ;;  %v4418_v14 = vpack.i.bf16 %v4061_v12, %v4060_v8  ;;  %v4421_v15 = vcombine.low %v4058_v10, %v4059_v11  ;;  %v4424_v16 = vpack.i.bf16 %v4059_v11, %v4058_v10 }
  0x10   : > { %v353_v5 = vld [vmem:[%s342_s15] sm:$0xff]  ;;  %v369_v7 = vld [vmem:[%s347_s18 + $0x8] sm:$0xff]  ;;  %s4325_s12 = smov 112   ;;  %s4328_s15 = smov 110  }
  0x11   : > { %355 = vrot.lane.b32.xlu0 %v353_v5, %s4318_s19  ;;  %374 = vrot.lane.b32.xlu1 %v369_v7, %s4318_s19  ;;  %v368_v9 = vld [vmem:[%s347_s18] sm:$0xff]  ;;  %s4331_s18 = smov 94  }
  0x15   : > { %372 = vrot.lane.b32.xlu0 %v368_v9, %s4318_s19  ;;  %795 = vrot.lane.b32.xlu1 %v4415_v13, %s4319_s20 }
  0x19   : > { %4280 = vrot.lane.b32.xlu0 %v4418_v14, %s4319_s20  ;;  %1005 = vrot.lane.b32.xlu1 %v4421_v15, %s4320_s21 }
  0x1d   : > { %4285 = vrot.lane.b32.xlu0 %v4424_v16, %s4320_s21  ;;  %1405 = vrot.lane.b32.xlu1 %v4415_v13, %s4321_s22 }
  0x83   : > { %v356_v17 = vpop.permute.xlu0 %355  ;;  %v375_v20 = vpop.permute.xlu1 %374 }
  0x84   : > { %v357_v19 = vrot.slane %v356_v17, 4  ;;  %383 = vst.msk [vmem:[#allocation3 + $0x10] sm:$0xff] %vm358_vm8, %v375_v20 }
  0x85   : > { %389 = vst.msk [vmem:[#allocation3 + $0x10] sm:$0xff] %vm388_vm9, %v4317_v1  ;;  %vm1226_vm9 = vcmask 908288  }
  0x86   : > { %v359_v21 = vsel %vm358_vm8, %v357_v19, %v356_v17  ;;  %367 = vst.msk [vmem:[#allocation2 + $0x8] sm:$0xf] %vm366_vm0, %v357_v19 }
  0x87   : > { %365 = vst.msk [vmem:[#allocation2] sm:$0xff] %vm4430_vm10, %v359_v21  ;;  %v373_v22 = vpop.permute.xlu0 %372  ;;  %v796_v33 = vpop.permute.xlu1 %795 }
  0x88   : > { %386 = vst.msk [vmem:[#allocation2 + $0x8] sm:$0xf] %vm385_vm1, %v4317_v1  ;;  %v4445_v23 = vsel %vm358_vm8, %v373_v22, %v375_v20  ;;  %v4471_v34 = vrot.slane %v796_v33, 4  ;;  %vm1008_vm1 = vcmask 130048  }
  0x89   : > { %384 = vst.msk [vmem:[#allocation2] sm:$0xf] %vm366_vm0, %v4317_v1  ;;  %v441_v24 = vmul.f32 %v4059_v11, %v4445_v23 }
  0x8a   : > { %381 = vst.msk [vmem:[#allocation3] sm:$0xff] %vm380_vm11, %v373_v22  ;;  %v4483_v37 = vsel %vm798_vm14, %v4471_v34, %v796_v33  ;;  %vm1425_vm11 = vcmask 900096  }
  0x8b   : > { %387 = vst.msk [vmem:[#allocation3] sm:$0xff] %vm358_vm8, %v4317_v1  ;;  %447 = vmatprep.subr.mxu0 %v441_v24  ;;  %v4281_v38 = vpop.permute.xlu0 %4280  ;;  %v1006_v42 = vpop.permute.xlu1 %1005 }
  0x8c   : > { %v4479_v35 = vld [vmem:[#allocation3 + $0x10] sm:$0xff]  ;;  %v4283_v40 = vunpack.i.h.bf16 %v4281_v38  ;;  %v4282_v41 = vunpack.i.l.bf16 %v4281_v38  ;;  %v4496_v45 = vrot.slane %v1006_v42, 4 }
  0x8e   : > { %v905_v46 = vsel %vm798_vm14, %v4282_v41, %v4283_v40  ;;  %v4505_v49 = vsel %vm1008_vm1, %v4496_v45, %v1006_v42  ;;  %v911_v52 = vmul.f32 %v4283_v40, %v4479_v35  ;;  %vm1635_vm14 = vcmask 785408  }
  0x8f   : > { %v601_v25 = vld [vmem:[#allocation2 + $0x8] sm:$0xf]  ;;  %v910_v48 = vmul.f32 %v905_v46, %v4445_v23  ;;  %v4286_v54 = vpop.permute.xlu0 %4285  ;;  %v1406_v63 = vpop.permute.xlu1 %1405 }
  0x90   : > { %v4450_v26 = vld [vmem:[#allocation2] sm:$0xff]  ;;  %611 = vrot.lane.b32.xlu1 %v601_v25, %s4322_s23  ;;  %v791_v36 = vld [vmem:[#allocation2 + $0x8] sm:$0xf]  ;;  %v4288_v56 = vunpack.i.h.bf16 %v4286_v54  ;;  %v4287_v57 = vunpack.i.l.bf16 %v4286_v54  ;;  %v4528_v2 = vrot.slane %v1406_v63, 4 }
  0x91   : > { %v4455_v27 = vcombine.high %v4450_v26, %v4450_v26  ;;  %v436_v29 = vmul.f32 %v4450_v26, %v4421_v15  ;;  %v803_v43 = vmul.f32 %v4471_v34, %v791_v36  ;;  %v802_v44 = vmul.f32 %v4483_v37, %v4450_v26  ;;  %v1004_v55 = vld [vmem:[#allocation2 + $0x8] sm:$0xf] }
  0x92   : > { %v4457_v28 = vld [vmem:[#allocation3] sm:$0xff]  ;;  %v1012_v51 = vmul.f32 %v4505_v49, %v4450_v26  ;;  %v1013_v58 = vmul.f32 %v4496_v45, %v1004_v55  ;;  %v1121_v59 = vmul.f32 %v4288_v56, %v4479_v35  ;;  %v1115_v60 = vsel %vm1008_vm1, %v4287_v57, %v4288_v56  ;;  %v1214_v0 = vld [vmem:[#allocation2 + $0x8] sm:$0xf] }
  0x93   : > { %v440_v30 = vmul.f32 %v4058_v10, %v4457_v28  ;;  %609 = vrot.lane.b32.xlu0 %v4455_v27, %s4322_s23  ;;  %v519_v32 = vcombine.high %v436_v29, %v436_v29  ;;  %v808_v47 = vcombine.high %v802_v44, %v802_v44  ;;  %v909_v50 = vmul.f32 %v4282_v41, %v4457_v28  ;;  %v1404_v6 = vld [vmem:[#allocation2 + $0x8] sm:$0xf] }
  0x94   : > { %706 = vrot.lane.b32.xlu1 %v4445_v23, %s4322_s23  ;;  %v1018_v53 = vcombine.high %v1012_v51, %v1012_v51  ;;  %v1120_v61 = vmul.f32 %v1115_v60, %v4445_v23  ;;  %v1119_v62 = vmul.f32 %v4287_v57, %v4457_v28  ;;  %v4534_v3 = vsel %vm1408_vm2, %v4528_v2, %v1406_v63 }
  0x95   : > { %448 = vmatpush1.msra.mxu0 %v440_v30  ;;  %v1412_v4 = vmul.f32 %v4534_v3, %v4450_v26  ;;  %v1413_v7 = vmul.f32 %v4528_v2, %v1404_v6  ;;  %vm1836_vm1 = vcmask 777216  }
  0x96   : > { %4063 = vmatprep.subr.msk.mxu0 %vm524_vm12, %v519_v32  ;;  %4062 = vmatmul.mubr.msk.f32.vlgmr.msra.gmra.mrb[0].mxu0 %vm443_vm13, %v442_v31 }
  0x97   : > { %4064 = vmatpush1.msk.msra.mxu0 %vm524_vm12, %v436_v29  ;;  %593 = vmatprep.mubr.f32.mxu0 %v4317_v1  ;;  %v1418_v5 = vcombine.high %v1412_v4, %v1412_v4  ;;  %v4070_v29 = vld [vmem:[%s4993_s3 + $0x4] sm:$0xf] }
  0x98   : > { %607 = vrot.lane.b32.xlu0 %v4450_v26, %s4322_s23  ;;  %704 = vrot.lane.b32.xlu1 %v4457_v28, %s4322_s23 }
  0x9c   : > { %708 = vrot.lane.b32.xlu0 %v4479_v35, %s4322_s23  ;;  %1615 = vrot.lane.b32.xlu1 %v4421_v15, %s4323_s28 }
  0x9e   : > { %4065 = vmatmul.mubr.msk.f32.vlgmr.msra.gmra.mrb[0].mxu0 %vm520_vm15, %v437_v39 }
  0x9f   : > { %687 = vmatprep.mubr.f32.mxu0 %v4317_v1 }
  0xa0   : > { %4290 = vrot.lane.b32.xlu0 %v4418_v14, %s4321_s22  ;;  %813 = vrot.lane.b32.xlu1 %v803_v43, %s4324_s29 }
  0xa4   : > { %811 = vrot.lane.b32.xlu0 %v808_v47, %s4324_s29  ;;  %919 = vrot.lane.b32.xlu1 %v910_v48, %s4324_s29  ;;  %v4072_v47 = vld [vmem:[%s4992_s2 + $0x8] sm:$0xf] }
  0xa8   : > { %809 = vrot.lane.b32.xlu0 %v802_v44, %s4324_s29  ;;  %917 = vrot.lane.b32.xlu1 %v909_v50, %s4324_s29 }
  0xac   : > { %921 = vrot.lane.b32.xlu0 %v911_v52, %s4324_s29  ;;  %1021 = vrot.lane.b32.xlu1 %v1018_v53, %s4325_s12 }
  0xb0   : > { %4295 = vrot.lane.b32.xlu0 %v4424_v16, %s4323_s28  ;;  %1019 = vrot.lane.b32.xlu1 %v1012_v51, %s4325_s12  ;;  %v1614_v51 = vld [vmem:[#allocation2 + $0x8] sm:$0xf] }
  0xb4   : > { %1023 = vrot.lane.b32.xlu0 %v1013_v58, %s4325_s12  ;;  %1131 = vrot.lane.b32.xlu1 %v1121_v59, %s4325_s12  ;;  %v4076_v58 = vld [vmem:[%s4993_s3 + $0x8] sm:$0xf] }
  0xb8   : > { %1129 = vrot.lane.b32.xlu0 %v1120_v61, %s4325_s12  ;;  %2015 = vrot.lane.b32.xlu1 %v4415_v13, %s4326_s13  ;;  %v4066_v13 = vld [vmem:[%s4992_s2 + $0x4] sm:$0xf] }
  0xbc   : > { %1127 = vrot.lane.b32.xlu0 %v1119_v62, %s4325_s12  ;;  %1224 = vrot.lane.b32.xlu1 %v1214_v0, %s4327_s14 }
  0xc0   : > { %1222 = vrot.lane.b32.xlu0 %v4455_v27, %s4327_s14  ;;  %1319 = vrot.lane.b32.xlu1 %v4445_v23, %s4327_s14 }
  0xc4   : > { %1220 = vrot.lane.b32.xlu0 %v4450_v26, %s4327_s14  ;;  %1317 = vrot.lane.b32.xlu1 %v4457_v28, %s4327_s14 }
  0xc8   : > { %1321 = vrot.lane.b32.xlu0 %v4479_v35, %s4327_s14  ;;  %1421 = vrot.lane.b32.xlu1 %v1418_v5, %s4328_s15 }
  0xcc   : > { %4300 = vrot.lane.b32.xlu0 %v4418_v14, %s4326_s13  ;;  %1419 = vrot.lane.b32.xlu1 %v1412_v4, %s4328_s15  ;;  %s4330_s13 = smov 95  }
  0xd0   : > { %1423 = vrot.lane.b32.xlu0 %v1413_v7, %s4328_s15 }
 0x102   : > { %v612_v8 = vpop.permute.xlu1 %611 }
 0x105   : > { %v610_v9 = vpop.permute.xlu0 %609 }
 0x106   : > { %v707_v10 = vpop.permute.xlu1 %706  ;;  %v615_v11 = vsel %vm613_vm3, %v610_v9, %v612_v8 }
 0x107   : > { %4067 = vmatprep.subr.msk.mxu0 %vm524_vm12, %v615_v11 }
 0x10a   : > { %v608_v12 = vpop.permute.xlu0 %607  ;;  %v705_v16 = vpop.permute.xlu1 %704 }
 0x10b   : > { %v614_v14 = vsel %vm613_vm3, %v608_v12, %v610_v9  ;;  %v710_v21 = vsel %vm613_vm3, %v705_v16, %v707_v10 }
 0x10c   : > { %4068 = vmatpush1.msk.msra.mxu0 %vm524_vm12, %v614_v14  ;;  %v1824_v14 = vld [vmem:[#allocation2 + $0x8] sm:$0xf] }
 0x10d   : > { %4069 = vmatmul.mubr.msk.f32.vlgmr.msra.gmra.mrb[0].mxu0 %vm520_vm15, %v4066_v13 }
 0x10e   : > { %v709_v17 = vpop.permute.xlu0 %708  ;;  %781 = vmatprep.mubr.f32.mxu0 %v4317_v1  ;;  %v1616_v19 = vpop.permute.xlu1 %1615 }
 0x10f   : > { %v711_v20 = vsel %vm613_vm3, %v707_v10, %v709_v17  ;;  %v4564_v22 = vrot.slane %v1616_v19, 4  ;;  %v4078_v10 = vld [vmem:[%s4992_s2 + $0xc] sm:$0xf] }
 0x110   : > { %717 = vmatprep.subr.mxu0 %v711_v20 }
 0x111   : > { %718 = vmatpush1.msra.mxu0 %v710_v21  ;;  %v4568_v24 = vsel %vm1618_vm4, %v4564_v22, %v1616_v19  ;;  %v1623_v53 = vmul.f32 %v4564_v22, %v1614_v51 }
 0x112   : > { %v4291_v25 = vpop.permute.xlu0 %4290  ;;  %v814_v32 = vpop.permute.xlu1 %813  ;;  %v1622_v33 = vmul.f32 %v4568_v24, %v4450_v26 }
 0x113   : > { %v4293_v30 = vunpack.i.h.bf16 %v4291_v25  ;;  %v4292_v31 = vunpack.i.l.bf16 %v4291_v25  ;;  %v4082_v25 = vld [vmem:[%s4993_s3 + $0xc] sm:$0xf] }
 0x114   : > { %v1628_v43 = vcombine.high %v1622_v33, %v1622_v33 }
 0x115   : > { %4071 = vmatmul.mubr.msk.f32.vlgmr.msra.gmra.mrb[0].mxu0 %vm443_vm13, %v4070_v29  ;;  %v1521_v36 = vmul.f32 %v4293_v30, %v4479_v35  ;;  %v1515_v38 = vsel %vm1408_vm2, %v4292_v31, %v4293_v30  ;;  %v1519_v46 = vmul.f32 %v4292_v31, %v4457_v28  ;;  %vm2035_vm2 = vcmask 769024  }
 0x116   : > { %v812_v39 = vpop.permute.xlu0 %811  ;;  %v1520_v40 = vmul.f32 %v1515_v38, %v4445_v23  ;;  %889 = vmatprep.mubr.f32.mxu0 %v4317_v1  ;;  %v920_v42 = vpop.permute.xlu1 %919 }
 0x117   : > { %v817_v41 = vsel %vm815_vm5, %v812_v39, %v814_v32  ;;  %1531 = vrot.lane.b32.xlu1 %v1521_v36, %s4328_s15 }
 0x118   : > { %4073 = vmatprep.subr.msk.mxu0 %vm524_vm12, %v817_v41  ;;  %1529 = vrot.lane.b32.xlu0 %v1520_v40, %s4328_s15  ;;  %v4084_v40 = vld [vmem:[%s4992_s2 + $0x10] sm:$0xf] }
 0x11a   : > { %v810_v44 = vpop.permute.xlu0 %809  ;;  %v918_v50 = vpop.permute.xlu1 %917 }
 0x11b   : > { %v816_v48 = vsel %vm815_vm5, %v810_v44, %v812_v39  ;;  %1631 = vrot.lane.b32.xlu1 %v1628_v43, %s4329_s24  ;;  %v923_v56 = vsel %vm815_vm5, %v918_v50, %v920_v42 }
 0x11c   : > { %4074 = vmatpush1.msk.msra.mxu0 %vm524_vm12, %v816_v48  ;;  %1527 = vrot.lane.b32.xlu0 %v1519_v46, %s4328_s15 }
 0x11d   : > { %4075 = vmatmul.mubr.msk.f32.vlgmr.msra.gmra.mrb[0].mxu0 %vm520_vm15, %v4072_v47 }
 0x11e   : > { %v922_v52 = vpop.permute.xlu0 %921  ;;  %994 = vmatprep.mubr.f32.mxu0 %v4317_v1  ;;  %v1022_v54 = vpop.permute.xlu1 %1021 }
 0x11f   : > { %1629 = vrot.lane.b32.xlu1 %v1622_v33, %s4329_s24  ;;  %v924_v55 = vsel %vm815_vm5, %v920_v42, %v922_v52 }
 0x120   : > { %1633 = vrot.lane.b32.xlu0 %v1623_v53, %s4329_s24  ;;  %930 = vmatprep.subr.mxu0 %v924_v55  ;;  %v4332_v55 = vmov 0  }
 0x121   : > { %931 = vmatpush1.msra.mxu0 %v923_v56  ;;  %4304 = vset.pattern.permute.xlu1 %v4332_v55 }
 0x122   : > { %v4296_v57 = vpop.permute.xlu0 %4295  ;;  %v1020_v61 = vpop.permute.xlu1 %1019  ;;  %4305 = vset.pattern.permute.xlu0 %v4332_v55 }
 0x123   : > { %v4298_v59 = vunpack.i.h.bf16 %v4296_v57  ;;  %v4297_v60 = vunpack.i.l.bf16 %v4296_v57  ;;  %v1026_v7 = vsel %vm1025_vm6, %v1020_v61, %v1022_v54 }
 0x125   : > { %v1731_v62 = vmul.f32 %v4298_v59, %v4479_v35  ;;  %4077 = vmatmul.mubr.msk.f32.vlgmr.msra.gmra.mrb[0].mxu0 %vm443_vm13, %v4076_v58  ;;  %v1725_v63 = vsel %vm1618_vm4, %v4297_v60, %v4298_v59  ;;  %v1729_v8 = vmul.f32 %v4297_v60, %v4457_v28 }
 0x126   : > { %v1024_v0 = vpop.permute.xlu0 %1023  ;;  %v1730_v4 = vmul.f32 %v1725_v63, %v4445_v23  ;;  %1099 = vmatprep.mubr.f32.mxu0 %v4317_v1  ;;  %v1132_v6 = vpop.permute.xlu1 %1131  ;;  %v4094_v63 = vld [vmem:[%s4993_s3 + $0x14] sm:$0xf] }
 0x127   : > { %v1027_v5 = vsel %vm1025_vm6, %v1022_v54, %v1024_v0  ;;  %1741 = vrot.lane.b32.xlu1 %v1731_v62, %s4329_s24  ;;  %v4088_v54 = vld [vmem:[%s4993_s3 + $0x10] sm:$0xf] }
 0x128   : > { %1739 = vrot.lane.b32.xlu0 %v1730_v4, %s4329_s24  ;;  %4079 = vmatprep.subr.msk.mxu0 %vm524_vm12, %v1027_v5 }
 0x129   : > { %4080 = vmatpush1.msk.msra.mxu0 %vm524_vm12, %v1026_v7 }
 0x12a   : > { %v1130_v9 = vpop.permute.xlu0 %1129  ;;  %v2016_v11 = vpop.permute.xlu1 %2015 }
 0x12b   : > { %1832 = vrot.lane.b32.xlu1 %v4455_v27, %s4330_s13  ;;  %v1134_v12 = vsel %vm1025_vm6, %v1130_v9, %v1132_v6  ;;  %v4620_v13 = vrot.slane %v2016_v11, 4 }
 0x12c   : > { %1737 = vrot.lane.b32.xlu0 %v1729_v8, %s4329_s24  ;;  %1140 = vmatprep.subr.mxu0 %v1134_v12  ;;  %v4096_v8 = vld [vmem:[%s4992_s2 + $0x18] sm:$0xf] }
 0x12d   : > { %4081 = vmatmul.mubr.msk.f32.vlgmr.msra.gmra.mrb[0].mxu0 %vm520_vm15, %v4078_v10  ;;  %v4626_v16 = vsel %vm2018_vm7, %v4620_v13, %v2016_v11 }
 0x12e   : > { %v1128_v17 = vpop.permute.xlu0 %1127  ;;  %1204 = vmatprep.mubr.f32.mxu0 %v4317_v1  ;;  %v1225_v19 = vpop.permute.xlu1 %1224  ;;  %v2022_v20 = vmul.f32 %v4626_v16, %v4450_v26 }
 0x12f   : > { %v1133_v27 = vsel %vm1025_vm6, %v1128_v17, %v1130_v9  ;;  %1830 = vrot.lane.b32.xlu1 %v4450_v26, %s4330_s13  ;;  %v2014_v26 = vld [vmem:[#allocation2 + $0x8] sm:$0xf]  ;;  %v4100_v17 = vld [vmem:[%s4993_s3 + $0x18] sm:$0xf] }
 0x130   : > { %1834 = vrot.lane.b32.xlu0 %v1824_v14, %s4330_s13  ;;  %1141 = vmatpush1.msra.mxu0 %v1133_v27  ;;  %v2028_v31 = vcombine.high %v2022_v20, %v2022_v20  ;;  %v2023_v38 = vmul.f32 %v4620_v13, %v2014_v26 }
 0x132   : > { %v1223_v21 = vpop.permute.xlu0 %1222  ;;  %v1320_v30 = vpop.permute.xlu1 %1319 }
 0x133   : > { %v1228_v29 = vsel %vm1226_vm9, %v1223_v21, %v1225_v19  ;;  %1931 = vrot.lane.b32.xlu1 %v4479_v35, %s4330_s13 }
 0x134   : > { %1929 = vrot.lane.b32.xlu0 %v4445_v23, %s4330_s13  ;;  %4085 = vmatprep.subr.msk.mxu0 %vm524_vm12, %v1228_v29 }
 0x135   : > { %4083 = vmatmul.mubr.msk.f32.vlgmr.msra.gmra.mrb[0].mxu0 %vm443_vm13, %v4082_v25 }
 0x136   : > { %v1221_v32 = vpop.permute.xlu0 %1220  ;;  %1300 = vmatprep.mubr.f32.mxu0 %v4317_v1  ;;  %v1318_v36 = vpop.permute.xlu1 %1317 }
 0x137   : > { %v1227_v33 = vsel %vm1226_vm9, %v1221_v32, %v1223_v21  ;;  %2031 = vrot.lane.b32.xlu1 %v2028_v31, %s4331_s18  ;;  %v1323_v43 = vsel %vm1226_vm9, %v1318_v36, %v1320_v30  ;;  %v4102_v31 = vld [vmem:[%s4992_s2 + $0x1c] sm:$0xf] }
 0x138   : > { %1927 = vrot.lane.b32.xlu0 %v4457_v28, %s4330_s13  ;;  %4086 = vmatpush1.msk.msra.mxu0 %vm524_vm12, %v1227_v33 }
 0x13a   : > { %v1322_v39 = vpop.permute.xlu0 %1321  ;;  %v1422_v42 = vpop.permute.xlu1 %1421 }
 0x13b   : > { %2029 = vrot.lane.b32.xlu1 %v2022_v20, %s4331_s18  ;;  %v1324_v41 = vsel %vm1226_vm9, %v1320_v30, %v1322_v39 }
 0x13c   : > { %2033 = vrot.lane.b32.xlu0 %v2023_v38, %s4331_s18  ;;  %1330 = vmatprep.subr.mxu0 %v1324_v41 }
 0x13d   : > { %4087 = vmatmul.mubr.msk.f32.vlgmr.msra.gmra.mrb[0].mxu0 %vm520_vm15, %v4084_v40  ;;  %v4106_v40 = vld [vmem:[%s4993_s3 + $0x1c] sm:$0xf] }
 0x13e   : > { %1331 = vmatpush1.msra.mxu0 %v1323_v43  ;;  %v4301_v44 = vpop.permute.xlu0 %4300  ;;  %1394 = vmatprep.mubr.f32.mxu0 %v4317_v1  ;;  %v1420_v51 = vpop.permute.xlu1 %1419 }
 0x13f   : > { %v4303_v46 = vunpack.i.h.bf16 %v4301_v44  ;;  %v4302_v47 = vunpack.i.l.bf16 %v4301_v44  ;;  %v1426_v57 = vsel %vm1425_vm11, %v1420_v51, %v1422_v42  ;;  %v4112_v51 = vld [vmem:[%s4993_s3 + $0x20] sm:$0xf] }
 0x141   : > { %v2131_v48 = vmul.f32 %v4303_v46, %v4479_v35  ;;  %v2125_v50 = vsel %vm2018_vm7, %v4302_v47, %v4303_v46  ;;  %v2129_v35 = vmul.f32 %v4302_v47, %v4457_v28  ;;  %v4090_v28 = vld [vmem:[%s4992_s2 + $0x14] sm:$0xf]  ;;  %v4108_v46 = vld [vmem:[%s4992_s2 + $0x20] sm:$0xf] }
 0x142   : > { %v1424_v52 = vpop.permute.xlu0 %1423  ;;  %v2130_v53 = vmul.f32 %v2125_v50, %v4445_v23  ;;  %v2223_v23 = vld [vmem:[%s4994_s4] sm:$0xf] }
 0x143   : > { %v1427_v56 = vsel %vm1425_vm11, %v1422_v42, %v1424_v52  ;;  %2141 = vrot.lane.b32.xlu1 %v2131_v48, %s4331_s18 }
 0x144   : > { %2139 = vrot.lane.b32.xlu0 %v2130_v53, %s4331_s18  ;;  %4091 = vmatprep.subr.msk.mxu0 %vm524_vm12, %v1427_v56 }
 0x145   : > { %4089 = vmatmul.mubr.msk.f32.vlgmr.msra.gmra.mrb[0].mxu0 %vm443_vm13, %v4088_v54 }
 0x146   : > { %4092 = vmatpush1.msk.msra.mxu0 %vm524_vm12, %v1426_v57  ;;  %1499 = vmatprep.mubr.f32.mxu0 %v4317_v1 }
 0x147   : > { %2226 = vperm.xlu1 %4304, %v2223_v23  }
 0x148   : > { %2137 = vrot.lane.b32.xlu0 %v2129_v35, %s4331_s18 }
 0x14d   : > { %4093 = vmatmul.mubr.msk.f32.vlgmr.msra.gmra.mrb[0].mxu0 %vm520_vm15, %v4090_v28 }
 0x14e   : > { %1604 = vmatprep.mubr.f32.mxu0 %v4317_v1 }
 0x189   : > { %v1532_v58 = vpop.permute.xlu1 %1531 }
 0x18a   : > { %v1530_v59 = vpop.permute.xlu0 %1529 }
 0x18b   : > { %v1534_v60 = vsel %vm1425_vm11, %v1530_v59, %v1532_v58 }
 0x18c   : > { %1540 = vmatprep.subr.mxu0 %v1534_v60 }
 0x18d   : > { %v1632_v61 = vpop.permute.xlu1 %1631 }
 0x18e   : > { %v1528_v62 = vpop.permute.xlu0 %1527 }
 0x18f   : > { %v1533_v0 = vsel %vm1425_vm11, %v1528_v62, %v1530_v59 }
 0x190   : > { %1541 = vmatpush1.msra.mxu0 %v1533_v0 }
 0x191   : > { %4095 = vmatmul.mubr.msk.f32.vlgmr.msra.gmra.mrb[0].mxu0 %vm443_vm13, %v4094_v63  ;;  %v1630_v4 = vpop.permute.xlu1 %1629 }
 0x192   : > { %v1634_v5 = vpop.permute.xlu0 %1633  ;;  %1709 = vmatprep.mubr.f32.mxu0 %v4317_v1  ;;  %v1636_v7 = vsel %vm1635_vm14, %v1630_v4, %v1632_v61 }
 0x193   : > { %v1637_v6 = vsel %vm1635_vm14, %v1632_v61, %v1634_v5 }
 0x194   : > { %4097 = vmatprep.subr.msk.mxu0 %vm524_vm12, %v1637_v6 }
 0x195   : > { %4098 = vmatpush1.msk.msra.mxu0 %vm524_vm12, %v1636_v7 }
 0x199   : > { %4099 = vmatmul.mubr.msk.f32.vlgmr.msra.gmra.mrb[0].mxu0 %vm520_vm15, %v4096_v8  ;;  %v1742_v9 = vpop.permute.xlu1 %1741 }
 0x19a   : > { %v1740_v10 = vpop.permute.xlu0 %1739  ;;  %1814 = vmatprep.mubr.f32.mxu0 %v4317_v1 }
 0x19b   : > { %v1744_v11 = vsel %vm1635_vm14, %v1740_v10, %v1742_v9 }
 0x19c   : > { %1750 = vmatprep.subr.mxu0 %v1744_v11 }
 0x19d   : > { %v1833_v12 = vpop.permute.xlu1 %1832 }
 0x19e   : > { %v1738_v14 = vpop.permute.xlu0 %1737 }
 0x19f   : > { %v1743_v27 = vsel %vm1635_vm14, %v1738_v14, %v1740_v10 }
 0x1a0   : > { %1751 = vmatpush1.msra.mxu0 %v1743_v27 }
 0x1a1   : > { %4101 = vmatmul.mubr.msk.f32.vlgmr.msra.gmra.mrb[0].mxu0 %vm443_vm13, %v4100_v17  ;;  %v1831_v19 = vpop.permute.xlu1 %1830 }
 0x1a2   : > { %v1835_v20 = vpop.permute.xlu0 %1834  ;;  %1910 = vmatprep.mubr.f32.mxu0 %v4317_v1  ;;  %v1837_v25 = vsel %vm1836_vm1, %v1831_v19, %v1833_v12 }
 0x1a3   : > { %v1838_v21 = vsel %vm1836_vm1, %v1833_v12, %v1835_v20 }
 0x1a4   : > { %4103 = vmatprep.subr.msk.mxu0 %vm524_vm12, %v1838_v21 }
 0x1a5   : > { %4104 = vmatpush1.msk.msra.mxu0 %vm524_vm12, %v1837_v25  ;;  %v1932_v29 = vpop.permute.xlu1 %1931 }
 0x1a6   : > { %v1930_v30 = vpop.permute.xlu0 %1929 }
 0x1a7   : > { %v1934_v26 = vsel %vm1836_vm1, %v1930_v30, %v1932_v29 }
 0x1a8   : > { %1940 = vmatprep.subr.mxu0 %v1934_v26 }
 0x1a9   : > { %4105 = vmatmul.mubr.msk.f32.vlgmr.msra.gmra.mrb[0].mxu0 %vm520_vm15, %v4102_v31  ;;  %v2032_v32 = vpop.permute.xlu1 %2031 }
 0x1aa   : > { %v1928_v33 = vpop.permute.xlu0 %1927  ;;  %2004 = vmatprep.mubr.f32.mxu0 %v4317_v1 }
 0x1ab   : > { %v1933_v36 = vsel %vm1836_vm1, %v1928_v33, %v1930_v30 }
 0x1ac   : > { %1941 = vmatpush1.msra.mxu0 %v1933_v36 }
 0x1ad   : > { %v2030_v38 = vpop.permute.xlu1 %2029 }
 0x1ae   : > { %v2034_v39 = vpop.permute.xlu0 %2033  ;;  %v2036_v42 = vsel %vm2035_vm2, %v2030_v38, %v2032_v32 }
 0x1af   : > { %v2037_v41 = vsel %vm2035_vm2, %v2032_v32, %v2034_v39  ;;  %v3094_v32 = vld [vmem:[%s4996_s6] sm:$0xf] }
 0x1b0   : > { %4109 = vmatprep.subr.msk.mxu0 %vm524_vm12, %v2037_v41 }
 0x1b1   : > { %4107 = vmatmul.mubr.msk.f32.vlgmr.msra.gmra.mrb[0].mxu0 %vm443_vm13, %v4106_v40 }
 0x1b2   : > { %4110 = vmatpush1.msk.msra.mxu0 %vm524_vm12, %v2036_v42  ;;  %2109 = vmatprep.mubr.f32.mxu0 %v4317_v1  ;;  %v4114_v42 = vld [vmem:[%s4995_s5 + $0x4] sm:$0xf] }
 0x1b5   : > { %v2142_v43 = vpop.permute.xlu1 %2141 }
 0x1b6   : > { %v2140_v44 = vpop.permute.xlu0 %2139 }
 0x1b7   : > { %v2144_v47 = vsel %vm2035_vm2, %v2140_v44, %v2142_v43 }
 0x1b8   : > { %2150 = vmatprep.subr.mxu0 %v2144_v47 }
 0x1b9   : > { %4111 = vmatmul.mubr.msk.f32.vlgmr.msra.gmra.mrb[0].mxu0 %vm520_vm15, %v4108_v46 }
 0x1ba   : > { %v2138_v48 = vpop.permute.xlu0 %2137  ;;  %2214 = vmatprep.mubr.f32.mxu0 %v4317_v1 }
 0x1bb   : > { %v2143_v50 = vsel %vm2035_vm2, %v2138_v48, %v2140_v44 }
 0x1bc   : > { %2151 = vmatpush1.msra.mxu0 %v2143_v50 }
 0x1c1   : > { %4113 = vmatmul.mubr.msk.f32.vlgmr.msra.gmra.mrb[0].mxu0 %vm443_vm13, %v4112_v51 }
 0x1c6   : > { %v2227_v52 = vpop.permute.xlu1 %2226 }
 0x294   : > { %v2216_v53 = vpop.f32.mrb[0].mxu0 }
 0x295   : > { %v2229_v54 = vadd.f32 %v2227_v52, %v2216_v53  ;;  %v2218_v55 = vpop.f32.mrb[1].mxu0 }
 0x296   : > { %v2230_v56 = vadd.f32 %v2227_v52, %v2218_v55  ;;  %v2246_v52 = vld [vmem:[%s4995_s5] sm:$0xf] }
 0x297   : > { %v2231_v35 = vmax.f32 %v2229_v54, 0.0 }
 0x298   : > { %v2232_v23 = vmax.f32 %v2230_v56, 0.0 }
 0x29a   : > { %v2235_v57 = vcombine.low %v2231_v35, %v2232_v23  ;;  %v4121_v23 = vld [vmem:[%s4995_s5 + $0x8] sm:$0xf] }
 0x29c   : > { %2236 = vrot.lane.b32.xlu0 %v2235_v57, %s4318_s19 }
 0x30e   : > { %v2237_v28 = vpop.permute.xlu0 %2236 }
 0x30f   : > { %v2238_v58 = vrot.slane %v2237_v28, 4 }
 0x311   : > { %v2239_v59 = vsel %vm358_vm8, %v2238_v58, %v2237_v28  ;;  %2243 = vst.msk [vmem:[#allocation4 + $0x8] sm:$0xf] %vm366_vm0, %v2238_v58 }
 0x312   : > { %2242 = vst.msk [vmem:[#allocation4] sm:$0xff] %vm4430_vm10, %v2239_v59 }
 0x318   : > { %v2247_v60 = vld [vmem:[#allocation4 + $0x8] sm:$0xf] }
 0x319   : > { %2257 = vrot.lane.b32.xlu0 %v2247_v60, %s4322_s23  ;;  %v2244_v61 = vld [vmem:[#allocation4] sm:$0xff]  ;;  %v2420_v4 = vld [vmem:[#allocation4 + $0x8] sm:$0xf] }
 0x31a   : > { %v2252_v62 = vcombine.high %v2244_v61, %v2244_v61  ;;  %v2421_v63 = vmul.f32 %v2244_v61, %v4483_v37  ;;  %v2517_v5 = vld [vmem:[#allocation4 + $0x8] sm:$0xf]  ;;  %v2422_v6 = vmul.f32 %v2420_v4, %v4471_v34  ;;  %v2518_v7 = vmul.f32 %v2244_v61, %v4505_v49 }
 0x31b   : > { %v2519_v8 = vmul.f32 %v2517_v5, %v4496_v45  ;;  %v2709_v10 = vld [vmem:[#allocation4 + $0x8] sm:$0xf]  ;;  %v2710_v11 = vmul.f32 %v2244_v61, %v4534_v3  ;;  %v2807_v17 = vmul.f32 %v2244_v61, %v4568_v24  ;;  %v2999_v25 = vmul.f32 %v2244_v61, %v4626_v16 }
 0x31c   : > { %2255 = vrot.lane.b32.xlu1 %v2252_v62, %s4322_s23  ;;  %v2427_v0 = vcombine.high %v2421_v63, %v2421_v63  ;;  %v2524_v9 = vcombine.high %v2518_v7, %v2518_v7  ;;  %v2614_v12 = vld [vmem:[#allocation4 + $0x8] sm:$0xf]  ;;  %v2711_v14 = vmul.f32 %v2709_v10, %v4528_v2  ;;  %v2245_v39 = vmul.f32 %v2244_v61, %v4421_v15 }
 0x31d   : > { %v2716_v27 = vcombine.high %v2710_v11, %v2710_v11  ;;  %v2813_v19 = vcombine.high %v2807_v17, %v2807_v17  ;;  %v2806_v20 = vld [vmem:[#allocation4 + $0x8] sm:$0xf]  ;;  %v3005_v30 = vcombine.high %v2999_v25, %v2999_v25 }
 0x31e   : > { %2430 = vrot.lane.b32.xlu0 %v2427_v0, %s4324_s29  ;;  %v2808_v21 = vmul.f32 %v2806_v20, %v4564_v22  ;;  %v2903_v29 = vld [vmem:[#allocation4 + $0x8] sm:$0xf]  ;;  %v2340_v44 = vcombine.high %v2245_v39, %v2245_v39 }
 0x31f   : > { %v2998_v31 = vld [vmem:[#allocation4 + $0x8] sm:$0xf] }
 0x320   : > { %2253 = vrot.lane.b32.xlu1 %v2244_v61, %s4322_s23  ;;  %v3000_v26 = vmul.f32 %v2998_v31, %v4620_v13  ;;  %v4125_v60 = vld [vmem:[%s4995_s5 + $0xc] sm:$0xf]  ;;  %v4141_v31 = vld [vmem:[%s4995_s5 + $0x1c] sm:$0xf] }
 0x322   : > { %2428 = vrot.lane.b32.xlu0 %v2421_v63, %s4324_s29 }
 0x324   : > { %2432 = vrot.lane.b32.xlu1 %v2422_v6, %s4324_s29  ;;  %v4129_v6 = vld [vmem:[%s4995_s5 + $0x10] sm:$0xf] }
 0x326   : > { %2529 = vrot.lane.b32.xlu0 %v2519_v8, %s4325_s12 }
 0x328   : > { %2527 = vrot.lane.b32.xlu1 %v2524_v9, %s4325_s12 }
 0x32a   : > { %2622 = vrot.lane.b32.xlu0 %v2252_v62, %s4327_s14 }
 0x32c   : > { %2525 = vrot.lane.b32.xlu1 %v2518_v7, %s4325_s12 }
 0x32e   : > { %2620 = vrot.lane.b32.xlu0 %v2244_v61, %s4327_s14 }
 0x330   : > { %2624 = vrot.lane.b32.xlu1 %v2614_v12, %s4327_s14 }
 0x332   : > { %2721 = vrot.lane.b32.xlu0 %v2711_v14, %s4328_s15 }
 0x334   : > { %2719 = vrot.lane.b32.xlu1 %v2716_v27, %s4328_s15 }
 0x336   : > { %2816 = vrot.lane.b32.xlu0 %v2813_v19, %s4329_s24  ;;  %v4137_v19 = vld [vmem:[%s4995_s5 + $0x18] sm:$0xf] }
 0x338   : > { %2717 = vrot.lane.b32.xlu1 %v2710_v11, %s4328_s15  ;;  %v4133_v11 = vld [vmem:[%s4995_s5 + $0x14] sm:$0xf] }
 0x33a   : > { %2814 = vrot.lane.b32.xlu0 %v2807_v17, %s4329_s24 }
 0x33c   : > { %2818 = vrot.lane.b32.xlu1 %v2808_v21, %s4329_s24 }
 0x33e   : > { %2913 = vrot.lane.b32.xlu0 %v2903_v29, %s4330_s13 }
 0x340   : > { %2911 = vrot.lane.b32.xlu1 %v2252_v62, %s4330_s13 }
 0x342   : > { %3008 = vrot.lane.b32.xlu0 %v3005_v30, %s4331_s18 }
 0x344   : > { %2909 = vrot.lane.b32.xlu1 %v2244_v61, %s4330_s13 }
 0x346   : > { %3006 = vrot.lane.b32.xlu0 %v2999_v25, %s4331_s18 }
 0x348   : > { %3010 = vrot.lane.b32.xlu1 %v3000_v26, %s4331_s18 }
 0x34c   : > { %3097 = vperm.xlu1 %4304, %v3094_v32   ;;  %v4145_v32 = vld [vmem:[%s4995_s5 + $0x20] sm:$0xf] }
 0x38b   : > { %v2258_v33 = vpop.permute.xlu0 %2257 }
 0x38e   : > { %v2256_v36 = vpop.permute.xlu1 %2255 }
 0x38f   : > { %v2260_v38 = vsel %vm613_vm3, %v2256_v36, %v2258_v33 }
 0x390   : > { %v2431_v40 = vpop.permute.xlu0 %2430  ;;  %4115 = vmatprep.subr.msk.mxu1 %vm524_vm12, %v2260_v38 }
 0x392   : > { %v2254_v41 = vpop.permute.xlu1 %2253 }
 0x393   : > { %v2259_v43 = vsel %vm613_vm3, %v2254_v41, %v2256_v36 }
 0x394   : > { %v2429_v46 = vpop.permute.xlu0 %2428  ;;  %4116 = vmatpush1.msk.msra.mxu1 %vm524_vm12, %v2259_v43 }
 0x395   : > { %4117 = vmatmul.mubr.msk.f32.vlgmr.msra.gmra.mrb[0].mxu1 %vm520_vm15, %v4114_v42  ;;  %4118 = vmatprep.subr.msk.mxu1 %vm524_vm12, %v2340_v44  ;;  %v2434_v53 = vsel %vm815_vm5, %v2429_v46, %v2431_v40 }
 0x396   : > { %v2433_v47 = vpop.permute.xlu1 %2432  ;;  %4119 = vmatpush1.msk.msra.mxu1 %vm524_vm12, %v2245_v39  ;;  %2412 = vmatprep.mubr.f32.mxu1 %v4317_v1 }
 0x397   : > { %v2435_v48 = vsel %vm815_vm5, %v2431_v40, %v2433_v47 }
 0x398   : > { %4122 = vmatprep.subr.msk.mxu1 %vm524_vm12, %v2435_v48  ;;  %v2530_v50 = vpop.permute.xlu0 %2529 }
 0x39a   : > { %v2528_v51 = vpop.permute.xlu1 %2527 }
 0x39b   : > { %v2532_v54 = vsel %vm1025_vm6, %v2528_v51, %v2530_v50 }
 0x39c   : > { %v2623_v56 = vpop.permute.xlu0 %2622 }
 0x39d   : > { %4120 = vmatmul.mubr.msk.f32.vlgmr.msra.gmra.mrb[0].mxu1 %vm520_vm15, %v2246_v52 }
 0x39e   : > { %4123 = vmatpush1.msk.msra.mxu1 %vm524_vm12, %v2434_v53  ;;  %v2526_v55 = vpop.permute.xlu1 %2525  ;;  %2507 = vmatprep.mubr.f32.mxu1 %v4317_v1 }
 0x39f   : > { %4126 = vmatprep.subr.msk.mxu1 %vm524_vm12, %v2532_v54  ;;  %v2531_v57 = vsel %vm1025_vm6, %v2526_v55, %v2528_v51 }
 0x3a0   : > { %v2621_v28 = vpop.permute.xlu0 %2620 }
 0x3a1   : > { %v2626_v63 = vsel %vm1226_vm9, %v2621_v28, %v2623_v56 }
 0x3a2   : > { %v2625_v35 = vpop.permute.xlu1 %2624 }
 0x3a3   : > { %v2627_v58 = vsel %vm1226_vm9, %v2623_v56, %v2625_v35 }
 0x3a4   : > { %v2722_v61 = vpop.permute.xlu0 %2721 }
 0x3a5   : > { %4124 = vmatmul.mubr.msk.f32.vlgmr.msra.gmra.mrb[0].mxu1 %vm520_vm15, %v4121_v23 }
 0x3a6   : > { %4127 = vmatpush1.msk.msra.mxu1 %vm524_vm12, %v2531_v57  ;;  %v2720_v59 = vpop.permute.xlu1 %2719  ;;  %2604 = vmatprep.mubr.f32.mxu1 %v4317_v1 }
 0x3a7   : > { %4130 = vmatprep.subr.msk.mxu1 %vm524_vm12, %v2627_v58  ;;  %v2724_v0 = vsel %vm1425_vm11, %v2720_v59, %v2722_v61 }
 0x3a8   : > { %v2817_v4 = vpop.permute.xlu0 %2816 }
 0x3aa   : > { %v2718_v62 = vpop.permute.xlu1 %2717 }
 0x3ab   : > { %v2723_v7 = vsel %vm1425_vm11, %v2718_v62, %v2720_v59 }
 0x3ac   : > { %v2815_v9 = vpop.permute.xlu0 %2814 }
 0x3ad   : > { %4128 = vmatmul.mubr.msk.f32.vlgmr.msra.gmra.mrb[0].mxu1 %vm520_vm15, %v4125_v60  ;;  %v2820_v12 = vsel %vm1635_vm14, %v2815_v9, %v2817_v4 }
 0x3ae   : > { %4131 = vmatpush1.msk.msra.mxu1 %vm524_vm12, %v2626_v63  ;;  %2699 = vmatprep.mubr.f32.mxu1 %v4317_v1  ;;  %v2819_v5 = vpop.permute.xlu1 %2818 }
 0x3af   : > { %4134 = vmatprep.subr.msk.mxu1 %vm524_vm12, %v2724_v0  ;;  %v2821_v8 = vsel %vm1635_vm14, %v2817_v4, %v2819_v5 }
 0x3b0   : > { %v2914_v14 = vpop.permute.xlu0 %2913 }
 0x3b2   : > { %v2912_v10 = vpop.permute.xlu1 %2911 }
 0x3b3   : > { %v2916_v27 = vsel %vm1836_vm1, %v2912_v10, %v2914_v14  ;;  %v3117_v14 = vld [vmem:[%s4997_s7] sm:$0xf] }
 0x3b4   : > { %v3009_v21 = vpop.permute.xlu0 %3008 }
 0x3b5   : > { %4132 = vmatmul.mubr.msk.f32.vlgmr.msra.gmra.mrb[0].mxu1 %vm520_vm15, %v4129_v6 }
 0x3b6   : > { %4135 = vmatpush1.msk.msra.mxu1 %vm524_vm12, %v2723_v7  ;;  %2796 = vmatprep.mubr.f32.mxu1 %v4317_v1  ;;  %v2910_v17 = vpop.permute.xlu1 %2909 }
 0x3b7   : > { %4138 = vmatprep.subr.msk.mxu1 %vm524_vm12, %v2821_v8  ;;  %v2915_v25 = vsel %vm1836_vm1, %v2910_v17, %v2912_v10 }
 0x3b8   : > { %v3007_v30 = vpop.permute.xlu0 %3006 }
 0x3b9   : > { %v3012_v26 = vsel %vm2035_vm2, %v3007_v30, %v3009_v21 }
 0x3ba   : > { %v3011_v20 = vpop.permute.xlu1 %3010 }
 0x3bb   : > { %v3013_v29 = vsel %vm2035_vm2, %v3009_v21, %v3011_v20 }
 0x3bd   : > { %4136 = vmatmul.mubr.msk.f32.vlgmr.msra.gmra.mrb[0].mxu1 %vm520_vm15, %v4133_v11 }
 0x3be   : > { %4139 = vmatpush1.msk.msra.mxu1 %vm524_vm12, %v2820_v12  ;;  %2893 = vmatprep.mubr.f32.mxu1 %v4317_v1 }
 0x3bf   : > { %4142 = vmatprep.subr.msk.mxu1 %vm524_vm12, %v2916_v27 }
 0x3c5   : > { %4140 = vmatmul.mubr.msk.f32.vlgmr.msra.gmra.mrb[0].mxu1 %vm520_vm15, %v4137_v19 }
 0x3c6   : > { %4143 = vmatpush1.msk.msra.mxu1 %vm524_vm12, %v2915_v25  ;;  %2988 = vmatprep.mubr.f32.mxu1 %v4317_v1  ;;  %v4156_v25 = vld [vmem:[%s4997_s7 + $0x8] sm:$0xf] }
 0x3c7   : > { %4146 = vmatprep.subr.msk.mxu1 %vm524_vm12, %v3013_v29 }
 0x3cb   : > { %v3098_v33 = vpop.permute.xlu1 %3097 }
 0x3cd   : > { %4144 = vmatmul.mubr.msk.f32.vlgmr.msra.gmra.mrb[0].mxu1 %vm520_vm15, %v4141_v31 }
 0x3ce   : > { %4147 = vmatpush1.msk.msra.mxu1 %vm524_vm12, %v3012_v26  ;;  %3085 = vmatprep.mubr.f32.mxu1 %v4317_v1 }
 0x3d5   : > { %4148 = vmatmul.mubr.msk.f32.vlgmr.msra.gmra.mrb[0].mxu1 %vm520_vm15, %v4145_v32  ;;  %v4160_v32 = vld [vmem:[%s4997_s7 + $0xc] sm:$0xf] }
 0x3d6   : > { %3203 = vmatprep.mubr.f32.mxu1 %v4317_v1 }
 0x4a8   : > { %v3087_v36 = vpop.f32.mrb[0].mxu1 }
 0x4a9   : > { %v3100_v38 = vadd.f32 %v3098_v33, %v3087_v36  ;;  %v3089_v39 = vpop.f32.mrb[1].mxu1 }
 0x4aa   : > { %v3101_v40 = vadd.f32 %v3098_v33, %v3089_v39 }
 0x4ab   : > { %v3102_v41 = vmax.f32 %v3100_v38, 0.0 }
 0x4ac   : > { %v3103_v42 = vmax.f32 %v3101_v40, 0.0 }
 0x4ae   : > { %v3106_v43 = vcombine.low %v3102_v41, %v3103_v42  ;;  %v4164_v42 = vld [vmem:[%s4997_s7 + $0x10] sm:$0xf] }
 0x4b0   : > { %3107 = vrot.lane.b32.xlu0 %v3106_v43, %s4318_s19 }
 0x522   : > { %v3108_v44 = vpop.permute.xlu0 %3107 }
 0x523   : > { %v3109_v46 = vrot.slane %v3108_v44, 4 }
 0x525   : > { %v3110_v47 = vsel %vm358_vm8, %v3109_v46, %v3108_v44  ;;  %3114 = vst.msk [vmem:[#allocation4 + $0x8] sm:$0xf] %vm366_vm0, %v3109_v46 }
 0x526   : > { %3113 = vst.msk [vmem:[#allocation4] sm:$0xff] %vm4430_vm10, %v3110_v47 }
 0x52c   : > { %v3118_v48 = vld [vmem:[#allocation4 + $0x8] sm:$0xf] }
 0x52d   : > { %3128 = vrot.lane.b32.xlu0 %v3118_v48, %s4322_s23  ;;  %v3115_v50 = vld [vmem:[#allocation4] sm:$0xff]  ;;  %v3291_v54 = vld [vmem:[#allocation4 + $0x8] sm:$0xf]  ;;  %v4168_v48 = vld [vmem:[%s4997_s7 + $0x14] sm:$0xf] }
 0x52e   : > { %v3123_v51 = vcombine.high %v3115_v50, %v3115_v50  ;;  %v3292_v52 = vmul.f32 %v3115_v50, %v4483_v37  ;;  %v3388_v55 = vld [vmem:[#allocation4 + $0x8] sm:$0xf]  ;;  %v3293_v18 = vmul.f32 %v3291_v54, %v4471_v34  ;;  %v3389_v56 = vmul.f32 %v3115_v50, %v4505_v49  ;;  %v4172_v54 = vld [vmem:[%s4997_s7 + $0x18] sm:$0xf] }
 0x52f   : > { %v3390_v35 = vmul.f32 %v3388_v55, %v4496_v45  ;;  %v3580_v23 = vld [vmem:[#allocation4 + $0x8] sm:$0xf]  ;;  %v3581_v34 = vmul.f32 %v3115_v50, %v4534_v3  ;;  %v3678_v45 = vmul.f32 %v3115_v50, %v4568_v24  ;;  %v3116_v0 = vmul.f32 %v3115_v50, %v4421_v15 }
 0x530   : > { %3126 = vrot.lane.b32.xlu1 %v3123_v51, %s4322_s23  ;;  %v3298_v53 = vcombine.high %v3292_v52, %v3292_v52  ;;  %v3395_v37 = vcombine.high %v3389_v56, %v3389_v56  ;;  %v3485_v57 = vld [vmem:[#allocation4 + $0x8] sm:$0xf]  ;;  %v3582_v49 = vmul.f32 %v3580_v23, %v4528_v2  ;;  %v3870_v2 = vmul.f32 %v3115_v50, %v4626_v16  ;;  %v4176_v23 = vld [vmem:[%s4997_s7 + $0x1c] sm:$0xf] }
 0x531   : > { %v3587_v28 = vcombine.high %v3581_v34, %v3581_v34  ;;  %v3684_v58 = vcombine.high %v3678_v45, %v3678_v45  ;;  %v3677_v59 = vld [vmem:[#allocation4 + $0x8] sm:$0xf]  ;;  %v3211_v8 = vcombine.high %v3116_v0, %v3116_v0 }
 0x532   : > { %3301 = vrot.lane.b32.xlu0 %v3298_v53, %s4324_s29  ;;  %v3679_v3 = vmul.f32 %v3677_v59, %v4564_v22  ;;  %v3774_v24 = vld [vmem:[#allocation4 + $0x8] sm:$0xf]  ;;  %v3876_v60 = vcombine.high %v3870_v2, %v3870_v2  ;;  %v3965_v22 = vld [vmem:[%s4998_s8] sm:$0xf] }
 0x533   : > { %v3869_v61 = vld [vmem:[#allocation4 + $0x8] sm:$0xf] }
 0x534   : > { %3124 = vrot.lane.b32.xlu1 %v3115_v50, %s4322_s23  ;;  %v3871_v62 = vmul.f32 %v3869_v61, %v4620_v13  ;;  %v4149_v13 = vld [vmem:[%s4997_s7 + $0x4] sm:$0xf] }
 0x536   : > { %3299 = vrot.lane.b32.xlu0 %v3292_v52, %s4324_s29 }
 0x538   : > { %3303 = vrot.lane.b32.xlu1 %v3293_v18, %s4324_s29 }
 0x53a   : > { %3400 = vrot.lane.b32.xlu0 %v3390_v35, %s4325_s12 }
 0x53c   : > { %3398 = vrot.lane.b32.xlu1 %v3395_v37, %s4325_s12 }
 0x53e   : > { %3493 = vrot.lane.b32.xlu0 %v3123_v51, %s4327_s14 }
 0x540   : > { %3396 = vrot.lane.b32.xlu1 %v3389_v56, %s4325_s12 }
 0x542   : > { %3491 = vrot.lane.b32.xlu0 %v3115_v50, %s4327_s14 }
 0x544   : > { %3495 = vrot.lane.b32.xlu1 %v3485_v57, %s4327_s14  ;;  %v4180_v57 = vld [vmem:[%s4997_s7 + $0x20] sm:$0xf]  ;;  %s352_s14 = scalar_lea.vmem %s4999_s9, %s4186_s11 }
 0x546   : > { %3592 = vrot.lane.b32.xlu0 %v3582_v49, %s4328_s15 }
 0x548   : > { %3590 = vrot.lane.b32.xlu1 %v3587_v28, %s4328_s15 }
 0x54a   : > { %3687 = vrot.lane.b32.xlu0 %v3684_v58, %s4329_s24 }
 0x54c   : > { %3588 = vrot.lane.b32.xlu1 %v3581_v34, %s4328_s15 }
 0x54e   : > { %3685 = vrot.lane.b32.xlu0 %v3678_v45, %s4329_s24 }
 0x550   : > { %3689 = vrot.lane.b32.xlu1 %v3679_v3, %s4329_s24 }
 0x552   : > { %3784 = vrot.lane.b32.xlu0 %v3774_v24, %s4330_s13 }
 0x554   : > { %3782 = vrot.lane.b32.xlu1 %v3123_v51, %s4330_s13 }
 0x556   : > { %3879 = vrot.lane.b32.xlu0 %v3876_v60, %s4331_s18 }
 0x558   : > { %3780 = vrot.lane.b32.xlu1 %v3115_v50, %s4330_s13 }
 0x55a   : > { %3877 = vrot.lane.b32.xlu0 %v3870_v2, %s4331_s18 }
 0x55c   : > { %3881 = vrot.lane.b32.xlu1 %v3871_v62, %s4331_s18 }
 0x560   : > { %3968 = vperm.xlu1 %4304, %v3965_v22  }
 0x59f   : > { %v3129_v16 = vpop.permute.xlu0 %3128 }
 0x5a2   : > { %v3127_v63 = vpop.permute.xlu1 %3126 }
 0x5a3   : > { %v3131_v4 = vsel %vm613_vm3, %v3127_v63, %v3129_v16 }
 0x5a4   : > { %v3302_v5 = vpop.permute.xlu0 %3301  ;;  %4150 = vmatprep.subr.msk.mxu1 %vm524_vm12, %v3131_v4 }
 0x5a6   : > { %v3125_v6 = vpop.permute.xlu1 %3124 }
 0x5a7   : > { %v3130_v7 = vsel %vm613_vm3, %v3125_v6, %v3127_v63 }
 0x5a8   : > { %v3300_v9 = vpop.permute.xlu0 %3299  ;;  %4151 = vmatpush1.msk.msra.mxu1 %vm524_vm12, %v3130_v7 }
 0x5a9   : > { %4152 = vmatmul.mubr.msk.f32.vlgmr.msra.gmra.mrb[2].mxu1 %vm520_vm15, %v4149_v13  ;;  %4153 = vmatprep.subr.msk.mxu1 %vm524_vm12, %v3211_v8  ;;  %v3305_v17 = vsel %vm815_vm5, %v3300_v9, %v3302_v5 }
 0x5aa   : > { %v3304_v15 = vpop.permute.xlu1 %3303  ;;  %4154 = vmatpush1.msk.msra.mxu1 %vm524_vm12, %v3116_v0  ;;  %3283 = vmatprep.mubr.f32.mxu1 %v4317_v1 }
 0x5ab   : > { %v3306_v10 = vsel %vm815_vm5, %v3302_v5, %v3304_v15 }
 0x5ac   : > { %4157 = vmatprep.subr.msk.mxu1 %vm524_vm12, %v3306_v10  ;;  %v3401_v11 = vpop.permute.xlu0 %3400 }
 0x5ae   : > { %v3399_v12 = vpop.permute.xlu1 %3398 }
 0x5af   : > { %v3403_v27 = vsel %vm1025_vm6, %v3399_v12, %v3401_v11 }
 0x5b0   : > { %v3494_v20 = vpop.permute.xlu0 %3493 }
 0x5b1   : > { %4155 = vmatmul.mubr.msk.f32.vlgmr.msra.gmra.mrb[2].mxu1 %vm520_vm15, %v3117_v14 }
 0x5b2   : > { %4158 = vmatpush1.msk.msra.mxu1 %vm524_vm12, %v3305_v17  ;;  %v3397_v19 = vpop.permute.xlu1 %3396  ;;  %3378 = vmatprep.mubr.f32.mxu1 %v4317_v1 }
 0x5b3   : > { %4161 = vmatprep.subr.msk.mxu1 %vm524_vm12, %v3403_v27  ;;  %v3402_v29 = vsel %vm1025_vm6, %v3397_v19, %v3399_v12 }
 0x5b4   : > { %v3492_v30 = vpop.permute.xlu0 %3491 }
 0x5b5   : > { %v3497_v38 = vsel %vm1226_vm9, %v3492_v30, %v3494_v20 }
 0x5b6   : > { %v3496_v21 = vpop.permute.xlu1 %3495 }
 0x5b7   : > { %v3498_v31 = vsel %vm1226_vm9, %v3494_v20, %v3496_v21 }
 0x5b8   : > { %v3593_v33 = vpop.permute.xlu0 %3592 }
 0x5b9   : > { %4159 = vmatmul.mubr.msk.f32.vlgmr.msra.gmra.mrb[2].mxu1 %vm520_vm15, %v4156_v25 }
 0x5ba   : > { %4162 = vmatpush1.msk.msra.mxu1 %vm524_vm12, %v3402_v29  ;;  %v3591_v26 = vpop.permute.xlu1 %3590  ;;  %3475 = vmatprep.mubr.f32.mxu1 %v4317_v1 }
 0x5bb   : > { %4165 = vmatprep.subr.msk.mxu1 %vm524_vm12, %v3498_v31  ;;  %v3595_v39 = vsel %vm1425_vm11, %v3591_v26, %v3593_v33 }
 0x5bc   : > { %v3688_v40 = vpop.permute.xlu0 %3687 }
 0x5be   : > { %v3589_v36 = vpop.permute.xlu1 %3588 }
 0x5bf   : > { %v3594_v43 = vsel %vm1425_vm11, %v3589_v36, %v3591_v26 }
 0x5c0   : > { %v3686_v46 = vpop.permute.xlu0 %3685 }
 0x5c1   : > { %4163 = vmatmul.mubr.msk.f32.vlgmr.msra.gmra.mrb[2].mxu1 %vm520_vm15, %v4160_v32  ;;  %v3691_v50 = vsel %vm1635_vm14, %v3686_v46, %v3688_v40 }
 0x5c2   : > { %4166 = vmatpush1.msk.msra.mxu1 %vm524_vm12, %v3497_v38  ;;  %3570 = vmatprep.mubr.f32.mxu1 %v4317_v1  ;;  %v3690_v41 = vpop.permute.xlu1 %3689 }
 0x5c3   : > { %4169 = vmatprep.subr.msk.mxu1 %vm524_vm12, %v3595_v39  ;;  %v3692_v44 = vsel %vm1635_vm14, %v3688_v40, %v3690_v41 }
 0x5c4   : > { %v3785_v51 = vpop.permute.xlu0 %3784 }
 0x5c6   : > { %v3783_v47 = vpop.permute.xlu1 %3782 }
 0x5c7   : > { %v3787_v53 = vsel %vm1836_vm1, %v3783_v47, %v3785_v51 }
 0x5c8   : > { %v3880_v18 = vpop.permute.xlu0 %3879 }
 0x5c9   : > { %4167 = vmatmul.mubr.msk.f32.vlgmr.msra.gmra.mrb[2].mxu1 %vm520_vm15, %v4164_v42 }
 0x5ca   : > { %4170 = vmatpush1.msk.msra.mxu1 %vm524_vm12, %v3594_v43  ;;  %3667 = vmatprep.mubr.f32.mxu1 %v4317_v1  ;;  %v3781_v52 = vpop.permute.xlu1 %3780 }
 0x5cb   : > { %4173 = vmatprep.subr.msk.mxu1 %vm524_vm12, %v3692_v44  ;;  %v3786_v56 = vsel %vm1836_vm1, %v3781_v52, %v3783_v47 }
 0x5cc   : > { %v3878_v37 = vpop.permute.xlu0 %3877 }
 0x5cd   : > { %v3883_v34 = vsel %vm2035_vm2, %v3878_v37, %v3880_v18 }
 0x5ce   : > { %v3882_v55 = vpop.permute.xlu1 %3881 }
 0x5cf   : > { %v3884_v35 = vsel %vm2035_vm2, %v3880_v18, %v3882_v55 }
 0x5d1   : > { %4171 = vmatmul.mubr.msk.f32.vlgmr.msra.gmra.mrb[2].mxu1 %vm520_vm15, %v4168_v48 }
 0x5d2   : > { %4174 = vmatpush1.msk.msra.mxu1 %vm524_vm12, %v3691_v50  ;;  %3764 = vmatprep.mubr.f32.mxu1 %v4317_v1 }
 0x5d3   : > { %4177 = vmatprep.subr.msk.mxu1 %vm524_vm12, %v3787_v53 }
 0x5d9   : > { %4175 = vmatmul.mubr.msk.f32.vlgmr.msra.gmra.mrb[2].mxu1 %vm520_vm15, %v4172_v54 }
 0x5da   : > { %4178 = vmatpush1.msk.msra.mxu1 %vm524_vm12, %v3786_v56  ;;  %3859 = vmatprep.mubr.f32.mxu1 %v4317_v1 }
 0x5db   : > { %4181 = vmatprep.subr.msk.mxu1 %vm524_vm12, %v3884_v35 }
 0x5df   : > { %v3969_v49 = vpop.permute.xlu1 %3968 }
 0x5e1   : > { %4179 = vmatmul.mubr.msk.f32.vlgmr.msra.gmra.mrb[2].mxu1 %vm520_vm15, %v4176_v23 }
 0x5e2   : > { %4182 = vmatpush1.msk.msra.mxu1 %vm524_vm12, %v3883_v34  ;;  %3956 = vmatprep.mubr.f32.mxu1 %v4317_v1 }
 0x5e9   : > { %4183 = vmatmul.mubr.msk.f32.vlgmr.msra.gmra.mrb[2].mxu1 %vm520_vm15, %v4180_v57 }
 0x6bc   : > { %v3958_v45 = vpop.f32.mrb[2].mxu1 }
 0x6bd   : > { %v3971_v28 = vadd.f32 %v3969_v49, %v3958_v45  ;;  %v3960_v58 = vpop.f32.mrb[3].mxu1 }
 0x6be   : > { %v3972_v59 = vadd.f32 %v3969_v49, %v3960_v58 }
 0x6bf   : > { %v3973_v3 = vmax.f32 %v3971_v28, 0.0 }
 0x6c0   : > { %v3974_v2 = vmax.f32 %v3972_v59, 0.0 }
 0x6c2   : > { %v3977_v24 = vcombine.low %v3973_v3, %v3974_v2 }
 0x6c4   : > { %3979 = vst [vmem:[%s352_s14] sm:$0xff] %v3977_v24 }
 0x6c5 PF: > { %s19_s30 = sadd.s32 1, %s4315_s30  }
 0x6c6   : > { %p16_p4 = scmp.ge.s32.totalorder %s19_s30, 4  }
 0x6c8   :  { %18 = sbr.rel (!%p16_p4) target bundleno = 1 (0x1), region = 121 }

</bundles_post_ra>
